<compile_context>
chip_gen: v7x
topology: tpu7x:2x2x1
jax: 0.10.0
libtpu: 0.0.40
codegen_flags: <defaults>
</compile_context>

<pallas_src>
import functools
import math

import jax
import jax.numpy as jnp
from jax.experimental import pallas as pl
from jax.experimental.pallas import tpu as pltpu


# ----------------------------------------------------------------------------
# helpers
# ----------------------------------------------------------------------------
def _round_up(x, m):
    return (x + m - 1) // m * m


def _pick_time_block(seq_len, max_unroll=32):
    """Largest time block that divides seq_len and keeps the batch-major output
    block (tb, t_blk, Hp) tile-legal (t_blk % 8 == 0, or t_blk == seq_len)."""
    for cand in range(min(seq_len, max_unroll), 0, -1):
        if seq_len % cand == 0 and (cand % 8 == 0 or cand == seq_len):
            return cand
    return seq_len


# ----------------------------------------------------------------------------
# LSTM recurrence kernel (serial part only: h @ W_hh^T + precomputed gates_x)
# ----------------------------------------------------------------------------
def _lstm_rec_kernel(gx_ref, w_hh_ref, y_ref, hN_ref, cN_ref, h_sc, c_sc,
                     *, t_blk, hidden_pad):
    """One time-block for one batch tile.

    gx_ref : (t_blk, tb, 4Hp) precomputed x-projection + bias (time-major slab)
    w_hh   : (Hp, 4Hp)        transposed recurrent weights (VMEM resident)
    y_ref  : (tb, t_blk, Hp)  rnn_out slab, written batch-major (no wrapper transpose)
    hN/cN  : (tb, Hp)         final states, written only on the last time step
    h_sc/c_sc : (tb, Hp)      f32 recurrent state scratch (persists across the time axis)
    """
    t = pl.program_id(1)

    @pl.when(t == 0)
    def _():
        h_sc[...] = jnp.zeros_like(h_sc)
        c_sc[...] = jnp.zeros_like(c_sc)

    Hp = hidden_pad
    h = h_sc[...]
    c = c_sc[...]

    # Static unroll: all slices / stores use compile-time, 128-lane-aligned offsets.
    for s in range(t_blk):
        gates = (gx_ref[s].astype(jnp.float32)
                 + jnp.dot(h.astype(w_hh_ref.dtype), w_hh_ref[...],
                           preferred_element_type=jnp.float32))        # (tb, 4Hp)
        i = jax.nn.sigmoid(gates[:, 0 * Hp:1 * Hp])    # PyTorch gate order: i, f, g, o
        f = jax.nn.sigmoid(gates[:, 1 * Hp:2 * Hp])
        g = jnp.tanh(gates[:, 2 * Hp:3 * Hp])
        o = jax.nn.sigmoid(gates[:, 3 * Hp:4 * Hp])
        c = f * c + i * g
        h = o * jnp.tanh(c)
        y_ref[:, s, :] = h.astype(y_ref.dtype)

    h_sc[...] = h
    c_sc[...] = c

    @pl.when(t == pl.num_programs(1) - 1)
    def _():
        hN_ref[...] = h.astype(hN_ref.dtype)
        cN_ref[...] = c.astype(cN_ref.dtype)


def lstm_forward(x, w_ih, w_hh, b_ih, b_hh, *, block_b=None, mxu_dtype=None):
    """Single-layer unidirectional LSTM (PyTorch weight layout).

    x: [B, S, E] (batch_first), w_ih: [4H, E], w_hh: [4H, H], b_*: [4H].
    Returns rnn_out [B, S, H] and (h_n, c_n) each [B, H].

    block_b : batch-tile size.  Default = whole (padded) batch, best for single-TC
              v5e/v6e; on v7x pass e.g. B//2 so two tiles shard across both TensorCores.
    mxu_dtype : optional dtype (e.g. jnp.bfloat16) for the matmul operands; state and
              accumulation stay f32.
    """
    B, S, E = x.shape
    H4 = w_ih.shape[0]
    H = H4 // 4

    Hp = _round_up(max(H, 1), 128)          # lane-aligned gate slabs / output stores
    Bp = _round_up(max(B, 1), 8)            # sublane-dense rows
    t_blk = _pick_time_block(S)
    n_t = S // t_blk

    if block_b is None:
        tb = Bp
    else:
        tb = min(_round_up(block_b, 8), Bp)
        while Bp % tb != 0:                 # keep a clean grid
            tb += 8
    nb = Bp // tb

    out_dtype = x.dtype
    op_dtype = out_dtype if mxu_dtype is None else mxu_dtype

    # --- weight prep: each gate occupies its own 128-lane-aligned [*, Hp] slab --------
    def pad_gate_cols(w_t):                 # [in, 4H] -> [in, 4Hp], zero-padded
        ind = w_t.shape[0]
        w4 = w_t.reshape(ind, 4, H)
        w4 = jnp.pad(w4, ((0, 0), (0, 0), (0, Hp - H)))
        return w4.reshape(ind, 4 * Hp)

    w_ih_t = pad_gate_cols(jnp.transpose(w_ih)).astype(jnp.float32)    # [E, 4Hp]
    w_hh_t = pad_gate_cols(jnp.transpose(w_hh))                        # [H, 4Hp]
    w_hh_t = jnp.pad(w_hh_t, ((0, Hp - H), (0, 0))).astype(op_dtype)   # [Hp, 4Hp]
    bias = jnp.pad((b_ih + b_hh).astype(jnp.float32).reshape(4, H),
                   ((0, 0), (0, Hp - H))).reshape(4 * Hp)              # [4Hp], pads = 0

    # --- hoisted, time-parallel input projection: one big MXU matmul in XLA -----------
    # (zero-padded gate columns + zero bias keep the padded h/c lanes exactly 0.)
    x_p = jnp.pad(x, ((0, Bp - B), (0, 0), (0, 0))) if Bp != B else x
    gx = jnp.einsum('bse,eg->sbg', x_p.astype(jnp.float32), w_ih_t,
                    preferred_element_type=jnp.float32) + bias         # [S, Bp, 4Hp]
    gx = gx.astype(op_dtype)                # time-major: cheap leading-axis reads in-kernel

    kernel = functools.partial(_lstm_rec_kernel, t_blk=t_blk, hidden_pad=Hp)

    y, h_n, c_n = pl.pallas_call(
        kernel,
        out_shape=(
            jax.ShapeDtypeStruct((Bp, S, Hp), out_dtype),   # rnn_out (batch-major)
            jax.ShapeDtypeStruct((Bp, Hp), out_dtype),      # h_n
            jax.ShapeDtypeStruct((Bp, Hp), out_dtype),      # c_n
        ),
        grid_spec=pltpu.PrefetchScalarGridSpec(
            num_scalar_prefetch=0,
            grid=(nb, n_t),                                  # (batch tiles, time blocks)
            in_specs=[
                pl.BlockSpec((t_blk, tb, 4 * Hp), lambda b, t: (t, b, 0)),  # gates_x slab
                # constant index map -> W_hh^T stays resident in VMEM across the grid
                # (on v7x with large H, add pipeline_mode=pl.Buffered(1) / bf16 to halve it)
                pl.BlockSpec((Hp, 4 * Hp), lambda b, t: (0, 0)),
            ],
            out_specs=(
                pl.BlockSpec((tb, t_blk, Hp), lambda b, t: (b, t, 0)),  # rnn_out slab
                pl.BlockSpec((tb, Hp), lambda b, t: (b, 0)),            # h_n (last step)
                pl.BlockSpec((tb, Hp), lambda b, t: (b, 0)),            # c_n (last step)
            ),
            scratch_shapes=[
                pltpu.VMEM((tb, Hp), jnp.float32),   # h state
                pltpu.VMEM((tb, Hp), jnp.float32),   # c state
            ],
        ),
        compiler_params=pltpu.CompilerParams(
            # batch tiles independent (megacore shard on v7x), time is a true recurrence
            dimension_semantics=("parallel", "arbitrary"),
        ),
    )(gx, w_hh_t)

    # Strip padding (no-op when B % 8 == 0 and H % 128 == 0).
    rnn_out = y[:B, :, :H]
    return rnn_out, (h_n[:B, :H], c_n[:B, :H])


# ----------------------------------------------------------------------------
# Module-level forward (mirrors RNN.forward for the default LSTM configuration)
# ----------------------------------------------------------------------------
def _dropout(x, p, rng):
    # Plain-JAX inverted dropout outside the kernel (PyTorch's RNG stream cannot be
    # matched anyway).  Default p = 0.0 keeps the hot path untouched.
    keep = jax.random.bernoulli(rng, 1.0 - p, x.shape)
    return jnp.where(keep, x / (1.0 - p), 0.0).astype(x.dtype)


def rnn_forward(params, line, *, dropout_in=0.0, dropout_out=0.0,
                classifier=False, apply_softmax=False, return_final=False,
                training=False, rng=None, block_b=None, mxu_dtype=None):
    """line: [batch, seq, embed].  Returns (out, rnn_out[, (h_n, c_n)])."""
    # TODO(synk): packed/padded variable-length sequences (pack_padded_sequence /
    # column_gatherer), bidirectional, multi-layer and GRU variants are not implemented.
    x = line
    if training and dropout_in > 0.0:
        rng = jax.random.PRNGKey(0) if rng is None else rng
        rng, sub = jax.random.split(rng)
        x = _dropout(x, dropout_in, sub)

    rnn_out, (h_n, c_n) = lstm_forward(
        x, params["w_ih"], params["w_hh"], params["b_ih"], params["b_hh"],
        block_b=block_b, mxu_dtype=mxu_dtype)

    if training and dropout_out > 0.0:
        rng = jax.random.PRNGKey(1) if rng is None else rng
        rng, sub = jax.random.split(rng)
        rnn_out = _dropout(rnn_out, dropout_out, sub)
        last = rnn_out[:, -1, :]        # post-dropout, matches the PyTorch module
    else:
        last = h_n                      # == rnn_out[:, -1, :] for unpadded inputs

    out = None
    if classifier:
        # labels is tiny (default 1): a [B,H]x[H,labels] GEMV is best left to plain XLA
        # (a dedicated pallas_call would be pure launch overhead + masked-lane stores).
        out = last @ jnp.transpose(params["w_out"]).astype(last.dtype) + params["b_out"]
        if apply_softmax:
            out = jax.nn.softmax(out, axis=-1)

    if return_final:
        return out, rnn_out, (h_n, c_n)
    return out, rnn_out


# ----------------------------------------------------------------------------
# Pure-JAX reference (lax.scan LSTM) for correctness checking
# ----------------------------------------------------------------------------
def lstm_reference(x, w_ih, w_hh, b_ih, b_hh):
    B, S, E = x.shape
    H = w_hh.shape[1]

    def step(carry, x_t):
        h, c = carry
        gates = x_t @ w_ih.T + b_ih + h @ w_hh.T + b_hh
        i, f, g, o = jnp.split(gates, 4, axis=-1)
        i = jax.nn.sigmoid(i)
        f = jax.nn.sigmoid(f)
        g = jnp.tanh(g)
        o = jax.nn.sigmoid(o)
        c = f * c + i * g
        h = o * jnp.tanh(c)
        return (h, c), h

    h0 = jnp.zeros((B, H), jnp.float32)
    c0 = jnp.zeros((B, H), jnp.float32)
    (hN, cN), ys = jax.lax.scan(step, (h0, c0), jnp.transpose(x, (1, 0, 2)))
    return jnp.transpose(ys, (1, 0, 2)), (hN, cN)


if __name__ == "__main__":
    # small shapes consistent with the module: batch=2, seq=8, embed=16, hidden=32, labels=1
    B, S, E, H, LABELS = 2, 8, 16, 32, 1
    key = jax.random.PRNGKey(0)
    ks = jax.random.split(key, 7)
    scale = 1.0 / math.sqrt(H)

    line = jax.random.normal(ks[0], (B, S, E), dtype=jnp.float32)
    params = dict(
        w_ih=jax.random.uniform(ks[1], (4 * H, E), jnp.float32, -scale, scale),
        w_hh=jax.random.uniform(ks[2], (4 * H, H), jnp.float32, -scale, scale),
        b_ih=jax.random.uniform(ks[3], (4 * H,), jnp.float32, -scale, scale),
        b_hh=jax.random.uniform(ks[4], (4 * H,), jnp.float32, -scale, scale),
        w_out=jax.random.uniform(ks[5], (LABELS, H), jnp.float32, -scale, scale),
        b_out=jax.random.uniform(ks[6], (LABELS,), jnp.float32, -scale, scale),
    )

    # full path: classifier + final states
    out, rnn_out, (h_n, c_n) = rnn_forward(params, line,
                                           classifier=True, return_final=True)
    jax.block_until_ready((out, rnn_out, h_n, c_n))

    ref_out, (ref_h, ref_c) = lstm_reference(
        line, params["w_ih"], params["w_hh"], params["b_ih"], params["b_hh"])
    ref_cls = ref_out[:, -1, :] @ params["w_out"].T + params["b_out"]

    assert rnn_out.shape == (B, S, H) and h_n.shape == (B, H) and c_n.shape == (B, H)
    assert jnp.allclose(rnn_out, ref_out, atol=1e-4, rtol=1e-4), "rnn_out mismatch"
    assert jnp.allclose(h_n, ref_h, atol=1e-4, rtol=1e-4), "h_n mismatch"
    assert jnp.allclose(c_n, ref_c, atol=1e-4, rtol=1e-4), "c_n mismatch"
    assert jnp.allclose(out, ref_cls, atol=1e-4, rtol=1e-4), "classifier mismatch"

    # default encoder-only path (classifier=False) -> (None, rnn_out)
    out_none, rnn_out2 = rnn_forward(params, line)
    rnn_out2 = jax.block_until_ready(rnn_out2)
    assert out_none is None
    assert jnp.allclose(rnn_out2, ref_out, atol=1e-4, rtol=1e-4)

    print("KERNEL_OK")
</pallas_src>

<mosaic_0001>
module attributes {stable_mosaic.version = 11 : i64} {
  func.func @_lstm_rec_kernel(%arg0: i32, %arg1: i32, %arg2: memref<8x8x512xf32, #tpu.memory_space<vmem>>, %arg3: memref<128x512xf32, #tpu.memory_space<vmem>>, %arg4: memref<8x8x128xf32, #tpu.memory_space<vmem>>, %arg5: memref<8x128xf32, #tpu.memory_space<vmem>>, %arg6: memref<8x128xf32, #tpu.memory_space<vmem>>, %arg7: memref<8x128xf32, #tpu.memory_space<vmem>>, %arg8: memref<8x128xf32, #tpu.memory_space<vmem>>) attributes {dimension_semantics = [#tpu.dimension_semantics<parallel>, #tpu.dimension_semantics<arbitrary>], iteration_bounds = array<i64: 1, 1>, scalar_prefetch = 0 : i64, scratch_operands = 2 : i64, tpu.core_type = #tpu.core_type<tc>, window_params = [{transform_indices = @transform_0, window_bounds = array<i64: 8, 8, 512>}, {pipeline_mode = #tpu.pipeline_mode<synchronous>, transform_indices = @transform_1, window_bounds = array<i64: 128, 512>}, {transform_indices = @transform_2, window_bounds = array<i64: 8, 8, 128>}, {transform_indices = @transform_3, window_bounds = array<i64: 8, 128>}, {transform_indices = @transform_4, window_bounds = array<i64: 8, 128>}]} {
    %c0_i32 = arith.constant 0 : i32
    %0 = arith.cmpi eq, %arg1, %c0_i32 : i32
    %1 = arith.extui %0 : i1 to i32
    %c0_i32_0 = arith.constant 0 : i32
    %2 = arith.cmpi ne, %1, %c0_i32_0 : i32
    scf.if %2 {
      %cst_98 = arith.constant 0.000000e+00 : f32
      %274 = vector.broadcast %cst_98 : f32 to vector<8x128xf32>
      %c0_99 = arith.constant 0 : index
      %c0_100 = arith.constant 0 : index
      %275 = vector.load %arg7[%c0_99, %c0_100] : memref<8x128xf32, #tpu.memory_space<vmem>>, vector<8x128xf32>
      tpu.vector_store %arg7[%c0_99, %c0_100], %274 {strides = array<i32>} : memref<8x128xf32, #tpu.memory_space<vmem>>, vector<8x128xf32>,
      %cst_101 = arith.constant 0.000000e+00 : f32
      %276 = vector.broadcast %cst_101 : f32 to vector<8x128xf32>
      %c0_102 = arith.constant 0 : index
      %c0_103 = arith.constant 0 : index
      %277 = vector.load %arg8[%c0_102, %c0_103] : memref<8x128xf32, #tpu.memory_space<vmem>>, vector<8x128xf32>
      tpu.vector_store %arg8[%c0_102, %c0_103], %276 {strides = array<i32>} : memref<8x128xf32, #tpu.memory_space<vmem>>, vector<8x128xf32>,
    } else {
    }
    %c0 = arith.constant 0 : index
    %c0_1 = arith.constant 0 : index
    %3 = vector.load %arg7[%c0, %c0_1] : memref<8x128xf32, #tpu.memory_space<vmem>>, vector<8x128xf32>
    %c0_2 = arith.constant 0 : index
    %c0_3 = arith.constant 0 : index
    %4 = vector.load %arg8[%c0_2, %c0_3] : memref<8x128xf32, #tpu.memory_space<vmem>>, vector<8x128xf32>
    %c0_4 = arith.constant 0 : index
    %c0_5 = arith.constant 0 : index
    %c0_6 = arith.constant 0 : index
    %5 = vector.load %arg2[%c0_4, %c0_5, %c0_6] : memref<8x8x512xf32, #tpu.memory_space<vmem>>, vector<1x8x512xf32>
    %6 = vector.shape_cast %5 : vector<1x8x512xf32> to vector<8x512xf32>
    %c0_7 = arith.constant 0 : index
    %c0_8 = arith.constant 0 : index
    %7 = vector.load %arg3[%c0_7, %c0_8] : memref<128x512xf32, #tpu.memory_space<vmem>>, vector<128x512xf32>
    %cst = arith.constant dense<0.000000e+00> : vector<8x512xf32>
    %8 = tpu.matmul %3, %7, %cst {dimension_numbers = #tpu.dot_dimension_numbers<[1], [0], [0], [1], [0, 0, 1, 1], [], []>} : vector<8x128xf32>, vector<128x512xf32>, vector<8x512xf32> -> vector<8x512xf32>
    %9 = arith.addf %6, %8 : vector<8x512xf32>
    %10 = vector.extract_strided_slice %9 {offsets = [0, 0], sizes = [8, 128], strides = [1, 1]} : vector<8x512xf32> to vector<8x128xf32>
    %11 = arith.negf %10 : vector<8x128xf32>
    %12 = math.exp %11 : vector<8x128xf32>
    %cst_9 = arith.constant 1.000000e+00 : f32
    %13 = vector.broadcast %cst_9 : f32 to vector<8x128xf32>
    %14 = arith.addf %13, %12 : vector<8x128xf32>
    %15 = arith.divf %13, %14 : vector<8x128xf32>
    %16 = vector.extract_strided_slice %9 {offsets = [0, 128], sizes = [8, 128], strides = [1, 1]} : vector<8x512xf32> to vector<8x128xf32>
    %17 = arith.negf %16 : vector<8x128xf32>
    %18 = math.exp %17 : vector<8x128xf32>
    %cst_10 = arith.constant 1.000000e+00 : f32
    %19 = vector.broadcast %cst_10 : f32 to vector<8x128xf32>
    %20 = arith.addf %19, %18 : vector<8x128xf32>
    %21 = arith.divf %19, %20 : vector<8x128xf32>
    %22 = vector.extract_strided_slice %9 {offsets = [0, 256], sizes = [8, 128], strides = [1, 1]} : vector<8x512xf32> to vector<8x128xf32>
    %23 = math.tanh %22 : vector<8x128xf32>
    %24 = vector.extract_strided_slice %9 {offsets = [0, 384], sizes = [8, 128], strides = [1, 1]} : vector<8x512xf32> to vector<8x128xf32>
    %25 = arith.negf %24 : vector<8x128xf32>
    %26 = math.exp %25 : vector<8x128xf32>
    %cst_11 = arith.constant 1.000000e+00 : f32
    %27 = vector.broadcast %cst_11 : f32 to vector<8x128xf32>
    %28 = arith.addf %27, %26 : vector<8x128xf32>
    %29 = arith.divf %27, %28 : vector<8x128xf32>
    %30 = arith.mulf %21, %4 : vector<8x128xf32>
    %31 = arith.mulf %15, %23 : vector<8x128xf32>
    %32 = arith.addf %30, %31 : vector<8x128xf32>
    %33 = math.tanh %32 : vector<8x128xf32>
    %34 = arith.mulf %29, %33 : vector<8x128xf32>
    %c0_12 = arith.constant 0 : index
    %c0_13 = arith.constant 0 : index
    %c0_14 = arith.constant 0 : index
    %35 = vector.load %arg4[%c0_12, %c0_13, %c0_14] : memref<8x8x128xf32, #tpu.memory_space<vmem>>, vector<8x1x128xf32>
    %36 = vector.shape_cast %35 : vector<8x1x128xf32> to vector<8x128xf32>
    %37 = vector.shape_cast %34 : vector<8x128xf32> to vector<8x1x128xf32>
    tpu.vector_store %arg4[%c0_12, %c0_13, %c0_14], %37 {strides = array<i32>} : memref<8x8x128xf32, #tpu.memory_space<vmem>>, vector<8x1x128xf32>,
    %c1 = arith.constant 1 : index
    %c0_15 = arith.constant 0 : index
    %c0_16 = arith.constant 0 : index
    %38 = vector.load %arg2[%c1, %c0_15, %c0_16] : memref<8x8x512xf32, #tpu.memory_space<vmem>>, vector<1x8x512xf32>
    %39 = vector.shape_cast %38 : vector<1x8x512xf32> to vector<8x512xf32>
    %c0_17 = arith.constant 0 : index
    %c0_18 = arith.constant 0 : index
    %40 = vector.load %arg3[%c0_17, %c0_18] : memref<128x512xf32, #tpu.memory_space<vmem>>, vector<128x512xf32>
    %cst_19 = arith.constant dense<0.000000e+00> : vector<8x512xf32>
    %41 = tpu.matmul %34, %40, %cst_19 {dimension_numbers = #tpu.dot_dimension_numbers<[1], [0], [0], [1], [0, 0, 1, 1], [], []>} : vector<8x128xf32>, vector<128x512xf32>, vector<8x512xf32> -> vector<8x512xf32>
    %42 = arith.addf %39, %41 : vector<8x512xf32>
    %43 = vector.extract_strided_slice %42 {offsets = [0, 0], sizes = [8, 128], strides = [1, 1]} : vector<8x512xf32> to vector<8x128xf32>
    %44 = arith.negf %43 : vector<8x128xf32>
    %45 = math.exp %44 : vector<8x128xf32>
    %cst_20 = arith.constant 1.000000e+00 : f32
    %46 = vector.broadcast %cst_20 : f32 to vector<8x128xf32>
    %47 = arith.addf %46, %45 : vector<8x128xf32>
    %48 = arith.divf %46, %47 : vector<8x128xf32>
    %49 = vector.extract_strided_slice %42 {offsets = [0, 128], sizes = [8, 128], strides = [1, 1]} : vector<8x512xf32> to vector<8x128xf32>
    %50 = arith.negf %49 : vector<8x128xf32>
    %51 = math.exp %50 : vector<8x128xf32>
    %cst_21 = arith.constant 1.000000e+00 : f32
    %52 = vector.broadcast %cst_21 : f32 to vector<8x128xf32>
    %53 = arith.addf %52, %51 : vector<8x128xf32>
    %54 = arith.divf %52, %53 : vector<8x128xf32>
    %55 = vector.extract_strided_slice %42 {offsets = [0, 256], sizes = [8, 128], strides = [1, 1]} : vector<8x512xf32> to vector<8x128xf32>
    %56 = math.tanh %55 : vector<8x128xf32>
    %57 = vector.extract_strided_slice %42 {offsets = [0, 384], sizes = [8, 128], strides = [1, 1]} : vector<8x512xf32> to vector<8x128xf32>
    %58 = arith.negf %57 : vector<8x128xf32>
    %59 = math.exp %58 : vector<8x128xf32>
    %cst_22 = arith.constant 1.000000e+00 : f32
    %60 = vector.broadcast %cst_22 : f32 to vector<8x128xf32>
    %61 = arith.addf %60, %59 : vector<8x128xf32>
    %62 = arith.divf %60, %61 : vector<8x128xf32>
    %63 = arith.mulf %54, %32 : vector<8x128xf32>
    %64 = arith.mulf %48, %56 : vector<8x128xf32>
    %65 = arith.addf %63, %64 : vector<8x128xf32>
    %66 = math.tanh %65 : vector<8x128xf32>
    %67 = arith.mulf %62, %66 : vector<8x128xf32>
    %c0_23 = arith.constant 0 : index
    %c1_24 = arith.constant 1 : index
    %c0_25 = arith.constant 0 : index
    %68 = vector.load %arg4[%c0_23, %c1_24, %c0_25] : memref<8x8x128xf32, #tpu.memory_space<vmem>>, vector<8x1x128xf32>
    %69 = vector.shape_cast %68 : vector<8x1x128xf32> to vector<8x128xf32>
    %70 = vector.shape_cast %67 : vector<8x128xf32> to vector<8x1x128xf32>
    tpu.vector_store %arg4[%c0_23, %c1_24, %c0_25], %70 {strides = array<i32>} : memref<8x8x128xf32, #tpu.memory_space<vmem>>, vector<8x1x128xf32>,
    %c2 = arith.constant 2 : index
    %c0_26 = arith.constant 0 : index
    %c0_27 = arith.constant 0 : index
    %71 = vector.load %arg2[%c2, %c0_26, %c0_27] : memref<8x8x512xf32, #tpu.memory_space<vmem>>, vector<1x8x512xf32>
    %72 = vector.shape_cast %71 : vector<1x8x512xf32> to vector<8x512xf32>
    %c0_28 = arith.constant 0 : index
    %c0_29 = arith.constant 0 : index
    %73 = vector.load %arg3[%c0_28, %c0_29] : memref<128x512xf32, #tpu.memory_space<vmem>>, vector<128x512xf32>
    %cst_30 = arith.constant dense<0.000000e+00> : vector<8x512xf32>
    %74 = tpu.matmul %67, %73, %cst_30 {dimension_numbers = #tpu.dot_dimension_numbers<[1], [0], [0], [1], [0, 0, 1, 1], [], []>} : vector<8x128xf32>, vector<128x512xf32>, vector<8x512xf32> -> vector<8x512xf32>
    %75 = arith.addf %72, %74 : vector<8x512xf32>
    %76 = vector.extract_strided_slice %75 {offsets = [0, 0], sizes = [8, 128], strides = [1, 1]} : vector<8x512xf32> to vector<8x128xf32>
    %77 = arith.negf %76 : vector<8x128xf32>
    %78 = math.exp %77 : vector<8x128xf32>
    %cst_31 = arith.constant 1.000000e+00 : f32
    %79 = vector.broadcast %cst_31 : f32 to vector<8x128xf32>
    %80 = arith.addf %79, %78 : vector<8x128xf32>
    %81 = arith.divf %79, %80 : vector<8x128xf32>
    %82 = vector.extract_strided_slice %75 {offsets = [0, 128], sizes = [8, 128], strides = [1, 1]} : vector<8x512xf32> to vector<8x128xf32>
    %83 = arith.negf %82 : vector<8x128xf32>
    %84 = math.exp %83 : vector<8x128xf32>
    %cst_32 = arith.constant 1.000000e+00 : f32
    %85 = vector.broadcast %cst_32 : f32 to vector<8x128xf32>
    %86 = arith.addf %85, %84 : vector<8x128xf32>
    %87 = arith.divf %85, %86 : vector<8x128xf32>
    %88 = vector.extract_strided_slice %75 {offsets = [0, 256], sizes = [8, 128], strides = [1, 1]} : vector<8x512xf32> to vector<8x128xf32>
    %89 = math.tanh %88 : vector<8x128xf32>
    %90 = vector.extract_strided_slice %75 {offsets = [0, 384], sizes = [8, 128], strides = [1, 1]} : vector<8x512xf32> to vector<8x128xf32>
    %91 = arith.negf %90 : vector<8x128xf32>
    %92 = math.exp %91 : vector<8x128xf32>
    %cst_33 = arith.constant 1.000000e+00 : f32
    %93 = vector.broadcast %cst_33 : f32 to vector<8x128xf32>
    %94 = arith.addf %93, %92 : vector<8x128xf32>
    %95 = arith.divf %93, %94 : vector<8x128xf32>
    %96 = arith.mulf %87, %65 : vector<8x128xf32>
    %97 = arith.mulf %81, %89 : vector<8x128xf32>
    %98 = arith.addf %96, %97 : vector<8x128xf32>
    %99 = math.tanh %98 : vector<8x128xf32>
    %100 = arith.mulf %95, %99 : vector<8x128xf32>
    %c0_34 = arith.constant 0 : index
    %c2_35 = arith.constant 2 : index
    %c0_36 = arith.constant 0 : index
    %101 = vector.load %arg4[%c0_34, %c2_35, %c0_36] : memref<8x8x128xf32, #tpu.memory_space<vmem>>, vector<8x1x128xf32>
    %102 = vector.shape_cast %101 : vector<8x1x128xf32> to vector<8x128xf32>
    %103 = vector.shape_cast %100 : vector<8x128xf32> to vector<8x1x128xf32>
    tpu.vector_store %arg4[%c0_34, %c2_35, %c0_36], %103 {strides = array<i32>} : memref<8x8x128xf32, #tpu.memory_space<vmem>>, vector<8x1x128xf32>,
    %c3 = arith.constant 3 : index
    %c0_37 = arith.constant 0 : index
    %c0_38 = arith.constant 0 : index
    %104 = vector.load %arg2[%c3, %c0_37, %c0_38] : memref<8x8x512xf32, #tpu.memory_space<vmem>>, vector<1x8x512xf32>
    %105 = vector.shape_cast %104 : vector<1x8x512xf32> to vector<8x512xf32>
    %c0_39 = arith.constant 0 : index
    %c0_40 = arith.constant 0 : index
    %106 = vector.load %arg3[%c0_39, %c0_40] : memref<128x512xf32, #tpu.memory_space<vmem>>, vector<128x512xf32>
    %cst_41 = arith.constant dense<0.000000e+00> : vector<8x512xf32>
    %107 = tpu.matmul %100, %106, %cst_41 {dimension_numbers = #tpu.dot_dimension_numbers<[1], [0], [0], [1], [0, 0, 1, 1], [], []>} : vector<8x128xf32>, vector<128x512xf32>, vector<8x512xf32> -> vector<8x512xf32>
    %108 = arith.addf %105, %107 : vector<8x512xf32>
    %109 = vector.extract_strided_slice %108 {offsets = [0, 0], sizes = [8, 128], strides = [1, 1]} : vector<8x512xf32> to vector<8x128xf32>
    %110 = arith.negf %109 : vector<8x128xf32>
    %111 = math.exp %110 : vector<8x128xf32>
    %cst_42 = arith.constant 1.000000e+00 : f32
    %112 = vector.broadcast %cst_42 : f32 to vector<8x128xf32>
    %113 = arith.addf %112, %111 : vector<8x128xf32>
    %114 = arith.divf %112, %113 : vector<8x128xf32>
    %115 = vector.extract_strided_slice %108 {offsets = [0, 128], sizes = [8, 128], strides = [1, 1]} : vector<8x512xf32> to vector<8x128xf32>
    %116 = arith.negf %115 : vector<8x128xf32>
    %117 = math.exp %116 : vector<8x128xf32>
    %cst_43 = arith.constant 1.000000e+00 : f32
    %118 = vector.broadcast %cst_43 : f32 to vector<8x128xf32>
    %119 = arith.addf %118, %117 : vector<8x128xf32>
    %120 = arith.divf %118, %119 : vector<8x128xf32>
    %121 = vector.extract_strided_slice %108 {offsets = [0, 256], sizes = [8, 128], strides = [1, 1]} : vector<8x512xf32> to vector<8x128xf32>
    %122 = math.tanh %121 : vector<8x128xf32>
    %123 = vector.extract_strided_slice %108 {offsets = [0, 384], sizes = [8, 128], strides = [1, 1]} : vector<8x512xf32> to vector<8x128xf32>
    %124 = arith.negf %123 : vector<8x128xf32>
    %125 = math.exp %124 : vector<8x128xf32>
    %cst_44 = arith.constant 1.000000e+00 : f32
    %126 = vector.broadcast %cst_44 : f32 to vector<8x128xf32>
    %127 = arith.addf %126, %125 : vector<8x128xf32>
    %128 = arith.divf %126, %127 : vector<8x128xf32>
    %129 = arith.mulf %120, %98 : vector<8x128xf32>
    %130 = arith.mulf %114, %122 : vector<8x128xf32>
    %131 = arith.addf %129, %130 : vector<8x128xf32>
    %132 = math.tanh %131 : vector<8x128xf32>
    %133 = arith.mulf %128, %132 : vector<8x128xf32>
    %c0_45 = arith.constant 0 : index
    %c3_46 = arith.constant 3 : index
    %c0_47 = arith.constant 0 : index
    %134 = vector.load %arg4[%c0_45, %c3_46, %c0_47] : memref<8x8x128xf32, #tpu.memory_space<vmem>>, vector<8x1x128xf32>
    %135 = vector.shape_cast %134 : vector<8x1x128xf32> to vector<8x128xf32>
    %136 = vector.shape_cast %133 : vector<8x128xf32> to vector<8x1x128xf32>
    tpu.vector_store %arg4[%c0_45, %c3_46, %c0_47], %136 {strides = array<i32>} : memref<8x8x128xf32, #tpu.memory_space<vmem>>, vector<8x1x128xf32>,
    %c4 = arith.constant 4 : index
    %c0_48 = arith.constant 0 : index
    %c0_49 = arith.constant 0 : index
    %137 = vector.load %arg2[%c4, %c0_48, %c0_49] : memref<8x8x512xf32, #tpu.memory_space<vmem>>, vector<1x8x512xf32>
    %138 = vector.shape_cast %137 : vector<1x8x512xf32> to vector<8x512xf32>
    %c0_50 = arith.constant 0 : index
    %c0_51 = arith.constant 0 : index
    %139 = vector.load %arg3[%c0_50, %c0_51] : memref<128x512xf32, #tpu.memory_space<vmem>>, vector<128x512xf32>
    %cst_52 = arith.constant dense<0.000000e+00> : vector<8x512xf32>
    %140 = tpu.matmul %133, %139, %cst_52 {dimension_numbers = #tpu.dot_dimension_numbers<[1], [0], [0], [1], [0, 0, 1, 1], [], []>} : vector<8x128xf32>, vector<128x512xf32>, vector<8x512xf32> -> vector<8x512xf32>
    %141 = arith.addf %138, %140 : vector<8x512xf32>
    %142 = vector.extract_strided_slice %141 {offsets = [0, 0], sizes = [8, 128], strides = [1, 1]} : vector<8x512xf32> to vector<8x128xf32>
    %143 = arith.negf %142 : vector<8x128xf32>
    %144 = math.exp %143 : vector<8x128xf32>
    %cst_53 = arith.constant 1.000000e+00 : f32
    %145 = vector.broadcast %cst_53 : f32 to vector<8x128xf32>
    %146 = arith.addf %145, %144 : vector<8x128xf32>
    %147 = arith.divf %145, %146 : vector<8x128xf32>
    %148 = vector.extract_strided_slice %141 {offsets = [0, 128], sizes = [8, 128], strides = [1, 1]} : vector<8x512xf32> to vector<8x128xf32>
    %149 = arith.negf %148 : vector<8x128xf32>
    %150 = math.exp %149 : vector<8x128xf32>
    %cst_54 = arith.constant 1.000000e+00 : f32
    %151 = vector.broadcast %cst_54 : f32 to vector<8x128xf32>
    %152 = arith.addf %151, %150 : vector<8x128xf32>
    %153 = arith.divf %151, %152 : vector<8x128xf32>
    %154 = vector.extract_strided_slice %141 {offsets = [0, 256], sizes = [8, 128], strides = [1, 1]} : vector<8x512xf32> to vector<8x128xf32>
    %155 = math.tanh %154 : vector<8x128xf32>
    %156 = vector.extract_strided_slice %141 {offsets = [0, 384], sizes = [8, 128], strides = [1, 1]} : vector<8x512xf32> to vector<8x128xf32>
    %157 = arith.negf %156 : vector<8x128xf32>
    %158 = math.exp %157 : vector<8x128xf32>
    %cst_55 = arith.constant 1.000000e+00 : f32
    %159 = vector.broadcast %cst_55 : f32 to vector<8x128xf32>
    %160 = arith.addf %159, %158 : vector<8x128xf32>
    %161 = arith.divf %159, %160 : vector<8x128xf32>
    %162 = arith.mulf %153, %131 : vector<8x128xf32>
    %163 = arith.mulf %147, %155 : vector<8x128xf32>
    %164 = arith.addf %162, %163 : vector<8x128xf32>
    %165 = math.tanh %164 : vector<8x128xf32>
    %166 = arith.mulf %161, %165 : vector<8x128xf32>
    %c0_56 = arith.constant 0 : index
    %c4_57 = arith.constant 4 : index
    %c0_58 = arith.constant 0 : index
    %167 = vector.load %arg4[%c0_56, %c4_57, %c0_58] : memref<8x8x128xf32, #tpu.memory_space<vmem>>, vector<8x1x128xf32>
    %168 = vector.shape_cast %167 : vector<8x1x128xf32> to vector<8x128xf32>
    %169 = vector.shape_cast %166 : vector<8x128xf32> to vector<8x1x128xf32>
    tpu.vector_store %arg4[%c0_56, %c4_57, %c0_58], %169 {strides = array<i32>} : memref<8x8x128xf32, #tpu.memory_space<vmem>>, vector<8x1x128xf32>,
    %c5 = arith.constant 5 : index
    %c0_59 = arith.constant 0 : index
    %c0_60 = arith.constant 0 : index
    %170 = vector.load %arg2[%c5, %c0_59, %c0_60] : memref<8x8x512xf32, #tpu.memory_space<vmem>>, vector<1x8x512xf32>
    %171 = vector.shape_cast %170 : vector<1x8x512xf32> to vector<8x512xf32>
    %c0_61 = arith.constant 0 : index
    %c0_62 = arith.constant 0 : index
    %172 = vector.load %arg3[%c0_61, %c0_62] : memref<128x512xf32, #tpu.memory_space<vmem>>, vector<128x512xf32>
    %cst_63 = arith.constant dense<0.000000e+00> : vector<8x512xf32>
    %173 = tpu.matmul %166, %172, %cst_63 {dimension_numbers = #tpu.dot_dimension_numbers<[1], [0], [0], [1], [0, 0, 1, 1], [], []>} : vector<8x128xf32>, vector<128x512xf32>, vector<8x512xf32> -> vector<8x512xf32>
    %174 = arith.addf %171, %173 : vector<8x512xf32>
    %175 = vector.extract_strided_slice %174 {offsets = [0, 0], sizes = [8, 128], strides = [1, 1]} : vector<8x512xf32> to vector<8x128xf32>
    %176 = arith.negf %175 : vector<8x128xf32>
    %177 = math.exp %176 : vector<8x128xf32>
    %cst_64 = arith.constant 1.000000e+00 : f32
    %178 = vector.broadcast %cst_64 : f32 to vector<8x128xf32>
    %179 = arith.addf %178, %177 : vector<8x128xf32>
    %180 = arith.divf %178, %179 : vector<8x128xf32>
    %181 = vector.extract_strided_slice %174 {offsets = [0, 128], sizes = [8, 128], strides = [1, 1]} : vector<8x512xf32> to vector<8x128xf32>
    %182 = arith.negf %181 : vector<8x128xf32>
    %183 = math.exp %182 : vector<8x128xf32>
    %cst_65 = arith.constant 1.000000e+00 : f32
    %184 = vector.broadcast %cst_65 : f32 to vector<8x128xf32>
    %185 = arith.addf %184, %183 : vector<8x128xf32>
    %186 = arith.divf %184, %185 : vector<8x128xf32>
    %187 = vector.extract_strided_slice %174 {offsets = [0, 256], sizes = [8, 128], strides = [1, 1]} : vector<8x512xf32> to vector<8x128xf32>
    %188 = math.tanh %187 : vector<8x128xf32>
    %189 = vector.extract_strided_slice %174 {offsets = [0, 384], sizes = [8, 128], strides = [1, 1]} : vector<8x512xf32> to vector<8x128xf32>
    %190 = arith.negf %189 : vector<8x128xf32>
    %191 = math.exp %190 : vector<8x128xf32>
    %cst_66 = arith.constant 1.000000e+00 : f32
    %192 = vector.broadcast %cst_66 : f32 to vector<8x128xf32>
    %193 = arith.addf %192, %191 : vector<8x128xf32>
    %194 = arith.divf %192, %193 : vector<8x128xf32>
    %195 = arith.mulf %186, %164 : vector<8x128xf32>
    %196 = arith.mulf %180, %188 : vector<8x128xf32>
    %197 = arith.addf %195, %196 : vector<8x128xf32>
    %198 = math.tanh %197 : vector<8x128xf32>
    %199 = arith.mulf %194, %198 : vector<8x128xf32>
    %c0_67 = arith.constant 0 : index
    %c5_68 = arith.constant 5 : index
    %c0_69 = arith.constant 0 : index
    %200 = vector.load %arg4[%c0_67, %c5_68, %c0_69] : memref<8x8x128xf32, #tpu.memory_space<vmem>>, vector<8x1x128xf32>
    %201 = vector.shape_cast %200 : vector<8x1x128xf32> to vector<8x128xf32>
    %202 = vector.shape_cast %199 : vector<8x128xf32> to vector<8x1x128xf32>
    tpu.vector_store %arg4[%c0_67, %c5_68, %c0_69], %202 {strides = array<i32>} : memref<8x8x128xf32, #tpu.memory_space<vmem>>, vector<8x1x128xf32>,
    %c6 = arith.constant 6 : index
    %c0_70 = arith.constant 0 : index
    %c0_71 = arith.constant 0 : index
    %203 = vector.load %arg2[%c6, %c0_70, %c0_71] : memref<8x8x512xf32, #tpu.memory_space<vmem>>, vector<1x8x512xf32>
    %204 = vector.shape_cast %203 : vector<1x8x512xf32> to vector<8x512xf32>
    %c0_72 = arith.constant 0 : index
    %c0_73 = arith.constant 0 : index
    %205 = vector.load %arg3[%c0_72, %c0_73] : memref<128x512xf32, #tpu.memory_space<vmem>>, vector<128x512xf32>
    %cst_74 = arith.constant dense<0.000000e+00> : vector<8x512xf32>
    %206 = tpu.matmul %199, %205, %cst_74 {dimension_numbers = #tpu.dot_dimension_numbers<[1], [0], [0], [1], [0, 0, 1, 1], [], []>} : vector<8x128xf32>, vector<128x512xf32>, vector<8x512xf32> -> vector<8x512xf32>
    %207 = arith.addf %204, %206 : vector<8x512xf32>
    %208 = vector.extract_strided_slice %207 {offsets = [0, 0], sizes = [8, 128], strides = [1, 1]} : vector<8x512xf32> to vector<8x128xf32>
    %209 = arith.negf %208 : vector<8x128xf32>
    %210 = math.exp %209 : vector<8x128xf32>
    %cst_75 = arith.constant 1.000000e+00 : f32
    %211 = vector.broadcast %cst_75 : f32 to vector<8x128xf32>
    %212 = arith.addf %211, %210 : vector<8x128xf32>
    %213 = arith.divf %211, %212 : vector<8x128xf32>
    %214 = vector.extract_strided_slice %207 {offsets = [0, 128], sizes = [8, 128], strides = [1, 1]} : vector<8x512xf32> to vector<8x128xf32>
    %215 = arith.negf %214 : vector<8x128xf32>
    %216 = math.exp %215 : vector<8x128xf32>
    %cst_76 = arith.constant 1.000000e+00 : f32
    %217 = vector.broadcast %cst_76 : f32 to vector<8x128xf32>
    %218 = arith.addf %217, %216 : vector<8x128xf32>
    %219 = arith.divf %217, %218 : vector<8x128xf32>
    %220 = vector.extract_strided_slice %207 {offsets = [0, 256], sizes = [8, 128], strides = [1, 1]} : vector<8x512xf32> to vector<8x128xf32>
    %221 = math.tanh %220 : vector<8x128xf32>
    %222 = vector.extract_strided_slice %207 {offsets = [0, 384], sizes = [8, 128], strides = [1, 1]} : vector<8x512xf32> to vector<8x128xf32>
    %223 = arith.negf %222 : vector<8x128xf32>
    %224 = math.exp %223 : vector<8x128xf32>
    %cst_77 = arith.constant 1.000000e+00 : f32
    %225 = vector.broadcast %cst_77 : f32 to vector<8x128xf32>
    %226 = arith.addf %225, %224 : vector<8x128xf32>
    %227 = arith.divf %225, %226 : vector<8x128xf32>
    %228 = arith.mulf %219, %197 : vector<8x128xf32>
    %229 = arith.mulf %213, %221 : vector<8x128xf32>
    %230 = arith.addf %228, %229 : vector<8x128xf32>
    %231 = math.tanh %230 : vector<8x128xf32>
    %232 = arith.mulf %227, %231 : vector<8x128xf32>
    %c0_78 = arith.constant 0 : index
    %c6_79 = arith.constant 6 : index
    %c0_80 = arith.constant 0 : index
    %233 = vector.load %arg4[%c0_78, %c6_79, %c0_80] : memref<8x8x128xf32, #tpu.memory_space<vmem>>, vector<8x1x128xf32>
    %234 = vector.shape_cast %233 : vector<8x1x128xf32> to vector<8x128xf32>
    %235 = vector.shape_cast %232 : vector<8x128xf32> to vector<8x1x128xf32>
    tpu.vector_store %arg4[%c0_78, %c6_79, %c0_80], %235 {strides = array<i32>} : memref<8x8x128xf32, #tpu.memory_space<vmem>>, vector<8x1x128xf32>,
    %c7 = arith.constant 7 : index
    %c0_81 = arith.constant 0 : index
    %c0_82 = arith.constant 0 : index
    %236 = vector.load %arg2[%c7, %c0_81, %c0_82] : memref<8x8x512xf32, #tpu.memory_space<vmem>>, vector<1x8x512xf32>
    %237 = vector.shape_cast %236 : vector<1x8x512xf32> to vector<8x512xf32>
    %c0_83 = arith.constant 0 : index
    %c0_84 = arith.constant 0 : index
    %238 = vector.load %arg3[%c0_83, %c0_84] : memref<128x512xf32, #tpu.memory_space<vmem>>, vector<128x512xf32>
    %cst_85 = arith.constant dense<0.000000e+00> : vector<8x512xf32>
    %239 = tpu.matmul %232, %238, %cst_85 {dimension_numbers = #tpu.dot_dimension_numbers<[1], [0], [0], [1], [0, 0, 1, 1], [], []>} : vector<8x128xf32>, vector<128x512xf32>, vector<8x512xf32> -> vector<8x512xf32>
    %240 = arith.addf %237, %239 : vector<8x512xf32>
    %241 = vector.extract_strided_slice %240 {offsets = [0, 0], sizes = [8, 128], strides = [1, 1]} : vector<8x512xf32> to vector<8x128xf32>
    %242 = arith.negf %241 : vector<8x128xf32>
    %243 = math.exp %242 : vector<8x128xf32>
    %cst_86 = arith.constant 1.000000e+00 : f32
    %244 = vector.broadcast %cst_86 : f32 to vector<8x128xf32>
    %245 = arith.addf %244, %243 : vector<8x128xf32>
    %246 = arith.divf %244, %245 : vector<8x128xf32>
    %247 = vector.extract_strided_slice %240 {offsets = [0, 128], sizes = [8, 128], strides = [1, 1]} : vector<8x512xf32> to vector<8x128xf32>
    %248 = arith.negf %247 : vector<8x128xf32>
    %249 = math.exp %248 : vector<8x128xf32>
    %cst_87 = arith.constant 1.000000e+00 : f32
    %250 = vector.broadcast %cst_87 : f32 to vector<8x128xf32>
    %251 = arith.addf %250, %249 : vector<8x128xf32>
    %252 = arith.divf %250, %251 : vector<8x128xf32>
    %253 = vector.extract_strided_slice %240 {offsets = [0, 256], sizes = [8, 128], strides = [1, 1]} : vector<8x512xf32> to vector<8x128xf32>
    %254 = math.tanh %253 : vector<8x128xf32>
    %255 = vector.extract_strided_slice %240 {offsets = [0, 384], sizes = [8, 128], strides = [1, 1]} : vector<8x512xf32> to vector<8x128xf32>
    %256 = arith.negf %255 : vector<8x128xf32>
    %257 = math.exp %256 : vector<8x128xf32>
    %cst_88 = arith.constant 1.000000e+00 : f32
    %258 = vector.broadcast %cst_88 : f32 to vector<8x128xf32>
    %259 = arith.addf %258, %257 : vector<8x128xf32>
    %260 = arith.divf %258, %259 : vector<8x128xf32>
    %261 = arith.mulf %252, %230 : vector<8x128xf32>
    %262 = arith.mulf %246, %254 : vector<8x128xf32>
    %263 = arith.addf %261, %262 : vector<8x128xf32>
    %264 = math.tanh %263 : vector<8x128xf32>
    %265 = arith.mulf %260, %264 : vector<8x128xf32>
    %c0_89 = arith.constant 0 : index
    %c7_90 = arith.constant 7 : index
    %c0_91 = arith.constant 0 : index
    %266 = vector.load %arg4[%c0_89, %c7_90, %c0_91] : memref<8x8x128xf32, #tpu.memory_space<vmem>>, vector<8x1x128xf32>
    %267 = vector.shape_cast %266 : vector<8x1x128xf32> to vector<8x128xf32>
    %268 = vector.shape_cast %265 : vector<8x128xf32> to vector<8x1x128xf32>
    tpu.vector_store %arg4[%c0_89, %c7_90, %c0_91], %268 {strides = array<i32>} : memref<8x8x128xf32, #tpu.memory_space<vmem>>, vector<8x1x128xf32>,
    %c0_92 = arith.constant 0 : index
    %c0_93 = arith.constant 0 : index
    %269 = vector.load %arg7[%c0_92, %c0_93] : memref<8x128xf32, #tpu.memory_space<vmem>>, vector<8x128xf32>
    tpu.vector_store %arg7[%c0_92, %c0_93], %265 {strides = array<i32>} : memref<8x128xf32, #tpu.memory_space<vmem>>, vector<8x128xf32>,
    %c0_94 = arith.constant 0 : index
    %c0_95 = arith.constant 0 : index
    %270 = vector.load %arg8[%c0_94, %c0_95] : memref<8x128xf32, #tpu.memory_space<vmem>>, vector<8x128xf32>
    tpu.vector_store %arg8[%c0_94, %c0_95], %263 {strides = array<i32>} : memref<8x128xf32, #tpu.memory_space<vmem>>, vector<8x128xf32>,
    %c0_i32_96 = arith.constant 0 : i32
    %271 = arith.cmpi eq, %arg1, %c0_i32_96 : i32
    %272 = arith.extui %271 : i1 to i32
    %c0_i32_97 = arith.constant 0 : i32
    %273 = arith.cmpi ne, %272, %c0_i32_97 : i32
    scf.if %273 {
      %c0_98 = arith.constant 0 : index
      %c0_99 = arith.constant 0 : index
      %274 = vector.load %arg5[%c0_98, %c0_99] : memref<8x128xf32, #tpu.memory_space<vmem>>, vector<8x128xf32>
      tpu.vector_store %arg5[%c0_98, %c0_99], %265 {strides = array<i32>} : memref<8x128xf32, #tpu.memory_space<vmem>>, vector<8x128xf32>,
      %c0_100 = arith.constant 0 : index
      %c0_101 = arith.constant 0 : index
      %275 = vector.load %arg6[%c0_100, %c0_101] : memref<8x128xf32, #tpu.memory_space<vmem>>, vector<8x128xf32>
      tpu.vector_store %arg6[%c0_100, %c0_101], %263 {strides = array<i32>} : memref<8x128xf32, #tpu.memory_space<vmem>>, vector<8x128xf32>,
    } else {
    }
    return
  }
  func.func @transform_0(%arg0: i32, %arg1: i32) -> (i32, i32, i32) {
    %c0_i32 = arith.constant 0 : i32
    %c0_i32_0 = arith.constant 0 : i32
    return %arg1, %arg0, %c0_i32 : i32, i32, i32
  }
  func.func @transform_1(%arg0: i32, %arg1: i32) -> (i32, i32) {
    %c0_i32 = arith.constant 0 : i32
    %c0_i32_0 = arith.constant 0 : i32
    %c0_i32_1 = arith.constant 0 : i32
    return %c0_i32, %c0_i32_0 : i32, i32
  }
  func.func @transform_2(%arg0: i32, %arg1: i32) -> (i32, i32, i32) {
    %c0_i32 = arith.constant 0 : i32
    %c0_i32_0 = arith.constant 0 : i32
    return %arg0, %arg1, %c0_i32 : i32, i32, i32
  }
  func.func @transform_3(%arg0: i32, %arg1: i32) -> (i32, i32) {
    %c0_i32 = arith.constant 0 : i32
    %c0_i32_0 = arith.constant 0 : i32
    return %arg0, %c0_i32 : i32, i32
  }
  func.func @transform_4(%arg0: i32, %arg1: i32) -> (i32, i32) {
    %c0_i32 = arith.constant 0 : i32
    %c0_i32_0 = arith.constant 0 : i32
    return %arg0, %c0_i32 : i32, i32
  }
}

</mosaic_0001>

<bundles_post_ra>
// kernel: tpu_custom_call.1
= control target key start
LH: loop header
LB: loop body
LE: loop exit
PB: predicated region body
PF: predicated region fallthrough
CT: control target
= control target key end

     0   :  { %10 = vsyncpa [#allocation5], 0  ;;  %s3978_s0 = inlined_call_operand.hbm [shape: f32[8,8,512], index: 0, kind: input, shape index: {}]   ;;  %s3979_s1 = inlined_call_operand.hbm [shape: f32[128,512], index: 1, kind: input, shape index: {}]   ;;  %s3980_s2 = inlined_call_operand.hbm [shape: f32[8,8,128], index: 2, kind: output, shape index: {0}]   ;;  %s3981_s3 = inlined_call_operand.hbm [shape: f32[8,128], index: 3, kind: output, shape index: {1}]   ;;  %s3982_s4 = inlined_call_operand.hbm [shape: f32[8,128], index: 4, kind: output, shape index: {2}]  }
   0x1   :  { %11 = vsyncpa [#allocation8], 0 }
   0x2   :  { %12 = vsyncpa [#allocation6], 0 }
   0x3   :  { %13 = vsyncpa [#allocation11], 0  ;;  %s3368_s15 = smov [#allocation4]   ;;  %s3250_s19 = scalar_lea.hbm %s3978_s0, 4096 }
   0x4   :  { %s19_s16 = sshll.u32 %s3368_s15, 4  ;;  %p3251_p0 = scmp.ne.s32.totalorder %s3978_s0, %s3250_s19  ;;  %s20_s16 = int_to_ptr.vmem [resolvable:$true] %s19_s16 }
   0x5   :  { %p3254_p1 = scmp.lt.u32.totalorder %s3250_s19, %s3978_s0 }
   0x7   :  { %p3256_p2 = pnand %p3254_p1, %p3251_p0 }
   0x9   :  { %3259 = shalt.err (!%p3256_p2)
}
   0xa   :  { %s3260_s24 = scalar_lea.vmem %s20_s16, 4096  ;;  %p3265_p4 = scmp.lt.s32.totalorder %s20_s16, %s20_s16 }
   0xb   :  { %p3261_p3 = scmp.ne.s32.totalorder %s20_s16, %s3260_s24  ;;  %p3266_p5 = scmp.lt.s32.totalorder %s3260_s24, %s3260_s24 }
   0xd   :  { %p3267_p6 = por %p3266_p5, %p3265_p4 }
   0xf   :  { %p3268_p7 = pnand %p3267_p6, %p3261_p3 }
  0x11   :  { %3271 = shalt.err (!%p3268_p7)
}
  0x12   :  { %s3369_s25 = smov 512   ;;  %s3370_s26 = smov 32  }
  0x13   :  { %25 = dma.hbm_to_vmem [thread:$0]  %s3978_s0, 4096, %s20_s16, [#allocation5], %s3369_s25, %s3369_s25, %s3370_s26  }
  0x14   :  { %s3371_s29 = smov [#allocation7]   ;;  %s3272_s7 = scalar_lea.hbm %s3979_s1, 8192 }
  0x15   :  { %s31_s30 = sshll.u32 %s3371_s29, 4  ;;  %p3273_p8 = scmp.ne.s32.totalorder %s3979_s1, %s3272_s7  ;;  %s32_s30 = int_to_ptr.vmem [resolvable:$true] %s31_s30 }
  0x16   :  { %p3276_p9 = scmp.lt.u32.totalorder %s3272_s7, %s3979_s1 }
  0x18   :  { %p3278_p10 = pnand %p3276_p9, %p3273_p8 }
  0x1a   :  { %3281 = shalt.err (!%p3278_p10)
}
  0x1b   :  { %s3282_s12 = scalar_lea.vmem %s32_s30, 8192  ;;  %p3287_p12 = scmp.lt.s32.totalorder %s32_s30, %s32_s30 }
  0x1c   :  { %p3283_p11 = scmp.ne.s32.totalorder %s32_s30, %s3282_s12  ;;  %p3288_p13 = scmp.lt.s32.totalorder %s3282_s12, %s3282_s12 }
  0x1e   :  { %p3289_p0 = por %p3288_p13, %p3287_p12 }
  0x20   :  { %p3290_p1 = pnand %p3289_p0, %p3283_p11 }
  0x22   :  { %3293 = shalt.err (!%p3290_p1)
}
  0x23   :  { %37 = dma.hbm_to_vmem [thread:$0]  %s3979_s1, 8192, %s32_s30, [#allocation8], %s3369_s25, %s3369_s25, %s3370_s26  }
  0x24   :  { %3360 = dma.done.wait [#allocation5], 4096  }
  0x25   :  { %3361 = vsyncadd [#allocation5], 4294963200 }
  0x26   :  { %3362 = dma.done.wait [#allocation8], 8192  }
  0x27   :  { %3363 = vsyncadd [#allocation8], 4294959104  ;;  %v3372_v0 = vmov 0.0   ;;  %v57_v1 = vld [vmem:[#allocation7 + $0x8] sm:$0xff]  ;;  %v56_v3 = vld [vmem:[#allocation7] sm:$0xff]  ;;  %s3374_s1 = smov [#allocation10]  }
  0x28   :  { %184 = vmatprep.mubr.f32.mxu0 %v3372_v0  ;;  %255 = vmatprep.mubr.f32.mxu1 %v3372_v0  ;;  %v61_v2 = vld [vmem:[#allocation7 + $0x28] sm:$0xff]  ;;  %v60_v5 = vld [vmem:[#allocation7 + $0x20] sm:$0xff]  ;;  %v59_v19 = vld [vmem:[#allocation7 + $0x18] sm:$0xff]  ;;  %s2516_s14 = sshll.u32 %s3374_s1, 4  ;;  %s3375_s15 = smov [#allocation12]   ;;  %s2517_s14 = int_to_ptr.vmem [resolvable:$true] %s2516_s14 }
  0x29   :  { %v3430_v4 = vpack.c.bf16 %v61_v2, %v57_v1  ;;  %v65_v6 = vld [vmem:[#allocation7 + $0x48] sm:$0xff]  ;;  %v3432_v8 = vpack.c.bf16 %v60_v5, %v56_v3  ;;  %v64_v10 = vld [vmem:[#allocation7 + $0x40] sm:$0xff]  ;;  %v63_v20 = vld [vmem:[#allocation7 + $0x38] sm:$0xff]  ;;  %s2526_s16 = sshll.u32 %s3375_s15, 4  ;;  %s3294_s17 = scalar_lea.vmem %s2517_s14, 128  ;;  %s3929_s16 = int_to_ptr.vmem [resolvable:$true] %s2526_s16 }
  0x2a   :  { %v69_v7 = vld [vmem:[#allocation7 + $0x68] sm:$0xff]  ;;  %v68_v11 = vld [vmem:[#allocation7 + $0x60] sm:$0xff]  ;;  %v3443_v22 = vpack.c.bf16 %v63_v20, %v59_v19  ;;  %v58_v23 = vld [vmem:[#allocation7 + $0x10] sm:$0xff]  ;;  %p3295_p2 = scmp.ne.s32.totalorder %s2517_s14, %s3294_s17  ;;  %p3299_p3 = scmp.lt.s32.totalorder %s2517_s14, %s2517_s14 }
  0x2b   :  { %v3434_v9 = vpack.c.bf16 %v69_v7, %v65_v6  ;;  %v73_v12 = vld [vmem:[#allocation7 + $0x88] sm:$0xff]  ;;  %2600 = vmatprep.subr.bf16.mxu0 %v3430_v4  ;;  %v3438_v14 = vpack.c.bf16 %v68_v11, %v64_v10  ;;  %v72_v15 = vld [vmem:[#allocation7 + $0x80] sm:$0xff]  ;;  %v62_v24 = vld [vmem:[#allocation7 + $0x30] sm:$0xff]  ;;  %p3300_p4 = scmp.lt.s32.totalorder %s3294_s17, %s3294_s17 }
  0x2c   :  { %v77_v13 = vld [vmem:[#allocation7 + $0xa8] sm:$0xff]  ;;  %2602 = vmatpush1.bf16.msra.mxu0 %v3432_v8  ;;  %v76_v16 = vld [vmem:[#allocation7 + $0xa0] sm:$0xff]  ;;  %v3445_v25 = vpack.c.bf16 %v62_v24, %v58_v23  ;;  %2632 = vmatprep.subr.bf16.mxu1 %v3443_v22  ;;  %v67_v27 = vld [vmem:[#allocation7 + $0x58] sm:$0xff] }
  0x2d   :  { %2604 = vmatprep.subr.bf16.mxu0 %v3434_v9  ;;  %v3441_v17 = vpack.c.bf16 %v77_v13, %v73_v12  ;;  %v81_v18 = vld [vmem:[#allocation7 + $0xc8] sm:$0xff]  ;;  %v3448_v26 = vpack.c.bf16 %v76_v16, %v72_v15  ;;  %v71_v28 = vld [vmem:[#allocation7 + $0x78] sm:$0xff]  ;;  %v66_v29 = vld [vmem:[#allocation7 + $0x50] sm:$0xff]  ;;  %p3301_p5 = por %p3300_p4, %p3299_p3 }
  0x2e   :  { %v85_v21 = vld [vmem:[#allocation7 + $0xe8] sm:$0xff]  ;;  %v80_v31 = vld [vmem:[#allocation7 + $0xc0] sm:$0xff]  ;;  %2634 = vmatpush1.bf16.msra.mxu1 %v3445_v25  ;;  %v3455_v33 = vpack.c.bf16 %v71_v28, %v67_v27  ;;  %v70_v34 = vld [vmem:[#allocation7 + $0x70] sm:$0xff] }
  0x2f   :  { %v3452_v30 = vpack.c.bf16 %v85_v21, %v81_v18  ;;  %v84_v32 = vld [vmem:[#allocation7 + $0xe0] sm:$0xff]  ;;  %v89_v35 = vld [vmem:[#allocation7 + $0x108] sm:$0xff]  ;;  %v3457_v37 = vpack.c.bf16 %v70_v34, %v66_v29  ;;  %v75_v38 = vld [vmem:[#allocation7 + $0x98] sm:$0xff]  ;;  %p3302_p6 = pnand %p3301_p5, %p3295_p2 }
  0x30   :  { %2606 = vmatpush1.bf16.msra.mxu0 %v3438_v14  ;;  %v93_v36 = vld [vmem:[#allocation7 + $0x128] sm:$0xff]  ;;  %2636 = vmatprep.subr.bf16.mxu1 %v3455_v33  ;;  %v79_v39 = vld [vmem:[#allocation7 + $0xb8] sm:$0xff]  ;;  %v74_v40 = vld [vmem:[#allocation7 + $0x90] sm:$0xff]  ;;  %v3461_v42 = vpack.c.bf16 %v84_v32, %v80_v31 }
  0x31   :  { %2608 = vmatprep.subr.bf16.mxu0 %v3441_v17  ;;  %v78_v41 = vld [vmem:[#allocation7 + $0xb0] sm:$0xff]  ;;  %v88_v43 = vld [vmem:[#allocation7 + $0x100] sm:$0xff]  ;;  %v3463_v45 = vpack.c.bf16 %v79_v39, %v75_v38  ;;  %v3466_v46 = vpack.c.bf16 %v93_v36, %v89_v35  ;;  %v97_v47 = vld [vmem:[#allocation7 + $0x148] sm:$0xff] }
  0x32   :  { %v92_v44 = vld [vmem:[#allocation7 + $0x120] sm:$0xff]  ;;  %2638 = vmatpush1.bf16.msra.mxu1 %v3457_v37  ;;  %v3469_v48 = vpack.c.bf16 %v78_v41, %v74_v40  ;;  %v83_v49 = vld [vmem:[#allocation7 + $0xd8] sm:$0xff]  ;;  %v101_v51 = vld [vmem:[#allocation7 + $0x168] sm:$0xff] }
  0x33   :  { %v87_v50 = vld [vmem:[#allocation7 + $0xf8] sm:$0xff]  ;;  %2640 = vmatprep.subr.bf16.mxu1 %v3463_v45  ;;  %v82_v53 = vld [vmem:[#allocation7 + $0xd0] sm:$0xff]  ;;  %v3475_v55 = vpack.c.bf16 %v92_v44, %v88_v43  ;;  %v3478_v58 = vpack.c.bf16 %v101_v51, %v97_v47  ;;  %v96_v59 = vld [vmem:[#allocation7 + $0x140] sm:$0xff] }
  0x34   :  { %2610 = vmatpush1.bf16.msra.mxu0 %v3448_v26  ;;  %v3472_v52 = vpack.c.bf16 %v87_v50, %v83_v49  ;;  %v86_v54 = vld [vmem:[#allocation7 + $0xf0] sm:$0xff]  ;;  %v91_v56 = vld [vmem:[#allocation7 + $0x118] sm:$0xff]  ;;  %v100_v60 = vld [vmem:[#allocation7 + $0x160] sm:$0xff] }
  0x35   :  { %2612 = vmatprep.subr.bf16.mxu0 %v3452_v30  ;;  %v95_v57 = vld [vmem:[#allocation7 + $0x138] sm:$0xff]  ;;  %v105_v61 = vld [vmem:[#allocation7 + $0x188] sm:$0xff]  ;;  %v3481_v62 = vpack.c.bf16 %v86_v54, %v82_v53  ;;  %v90_v2 = vld [vmem:[#allocation7 + $0x110] sm:$0xff]  ;;  %v3487_v7 = vpack.c.bf16 %v100_v60, %v96_v59 }
  0x36   :  { %2642 = vmatpush1.bf16.msra.mxu1 %v3469_v48  ;;  %v109_v63 = vld [vmem:[#allocation7 + $0x1a8] sm:$0xff]  ;;  %v3484_v1 = vpack.c.bf16 %v95_v57, %v91_v56  ;;  %v94_v3 = vld [vmem:[#allocation7 + $0x130] sm:$0xff]  ;;  %v99_v5 = vld [vmem:[#allocation7 + $0x158] sm:$0xff] }
  0x37   :  { %2644 = vmatprep.subr.bf16.mxu1 %v3472_v52  ;;  %v103_v6 = vld [vmem:[#allocation7 + $0x178] sm:$0xff]  ;;  %v3490_v10 = vpack.c.bf16 %v109_v63, %v105_v61  ;;  %v104_v11 = vld [vmem:[#allocation7 + $0x180] sm:$0xff]  ;;  %v113_v13 = vld [vmem:[#allocation7 + $0x1c8] sm:$0xff]  ;;  %v3493_v15 = vpack.c.bf16 %v94_v3, %v90_v2 }
  0x38   :  { %2614 = vmatpush1.bf16.msra.mxu0 %v3461_v42  ;;  %v108_v12 = vld [vmem:[#allocation7 + $0x1a0] sm:$0xff]  ;;  %v117_v16 = vld [vmem:[#allocation7 + $0x1e8] sm:$0xff]  ;;  %v3496_v18 = vpack.c.bf16 %v103_v6, %v99_v5  ;;  %v98_v19 = vld [vmem:[#allocation7 + $0x150] sm:$0xff] }
  0x39   :  { %2616 = vmatprep.subr.bf16.mxu0 %v3466_v46  ;;  %v102_v20 = vld [vmem:[#allocation7 + $0x170] sm:$0xff]  ;;  %v107_v21 = vld [vmem:[#allocation7 + $0x198] sm:$0xff]  ;;  %v3499_v24 = vpack.c.bf16 %v108_v12, %v104_v11  ;;  %v3502_v27 = vpack.c.bf16 %v117_v16, %v113_v13  ;;  %v112_v28 = vld [vmem:[#allocation7 + $0x1c0] sm:$0xff] }
  0x3a   :  { %2646 = vmatpush1.bf16.msra.mxu1 %v3481_v62  ;;  %v111_v23 = vld [vmem:[#allocation7 + $0x1b8] sm:$0xff]  ;;  %v116_v29 = vld [vmem:[#allocation7 + $0x1e0] sm:$0xff]  ;;  %v3505_v31 = vpack.c.bf16 %v102_v20, %v98_v19  ;;  %v106_v34 = vld [vmem:[#allocation7 + $0x190] sm:$0xff] }
  0x3b   :  { %2648 = vmatprep.subr.bf16.mxu1 %v3484_v1  ;;  %v3508_v32 = vpack.c.bf16 %v111_v23, %v107_v21  ;;  %v110_v35 = vld [vmem:[#allocation7 + $0x1b0] sm:$0xff]  ;;  %v115_v36 = vld [vmem:[#allocation7 + $0x1d8] sm:$0xff]  ;;  %v3511_v39 = vpack.c.bf16 %v116_v29, %v112_v28  ;;  %v52_v49 = vld [vmem:[#allocation4] sm:$0xff] }
  0x3c   :  { %2618 = vmatpush1.bf16.msra.mxu0 %v3475_v55  ;;  %v119_v38 = vld [vmem:[#allocation7 + $0x1f8] sm:$0xff]  ;;  %v3515_v40 = vpack.c.bf16 %v110_v35, %v106_v34  ;;  %v114_v43 = vld [vmem:[#allocation7 + $0x1d0] sm:$0xff]  ;;  %v53_v50 = vld [vmem:[#allocation4 + $0x8] sm:$0xff]  ;;  %v3373_v35 = vmov 1966171168  }
  0x3d   :  { %2620 = vmatprep.subr.bf16.mxu0 %v3478_v58  ;;  %v3518_v41 = vpack.c.bf16 %v119_v38, %v115_v36  ;;  %v118_v44 = vld [vmem:[#allocation7 + $0x1f0] sm:$0xff]  ;;  %v55_v60 = vld [vmem:[#allocation4 + $0x18] sm:$0xff]  ;;  %v293_v36 = vunpack.c.l.s4 %v3373_v35  ;;  %v295_v38 = vlaneseq }
  0x3e   :  { %2650 = vmatpush1.bf16.msra.mxu1 %v3493_v15  ;;  %v3522_v47 = vpack.c.bf16 %v118_v44, %v114_v43  ;;  %v54_v2 = vld [vmem:[#allocation4 + $0x10] sm:$0xff] }
  0x3f   :  { %2652 = vmatprep.subr.bf16.mxu1 %v3496_v18  ;;  %v294_v43 = vunpack.c.0.s8 %v293_v36  ;;  %v296_v44 = vshrl.u32 %v295_v38, 7 }
  0x40   :  { %2622 = vmatpush1.bf16.msra.mxu0 %v3487_v7 }
  0x41   :  { %2624 = vmatprep.subr.bf16.mxu0 %v3490_v10 }
  0x42   :  { %2654 = vmatpush1.bf16.msra.mxu1 %v3505_v31 }
  0x43   :  { %2656 = vmatprep.subr.bf16.mxu1 %v3508_v32 }
  0x44   :  { %2626 = vmatpush1.bf16.msra.mxu0 %v3499_v24 }
  0x45   :  { %2628 = vmatprep.subr.bf16.mxu0 %v3502_v27 }
  0x46   :  { %2658 = vmatpush1.bf16.msra.mxu1 %v3515_v40 }
  0x47   :  { %2660 = vmatprep.subr.bf16.mxu1 %v3518_v41 }
  0x48   :  { %2630 = vmatpush1.bf16.msra.mxu0 %v3511_v39 }
  0x49   :  { %2664 = vmatprep.subr.bf16.mxu0 %v3430_v4 }
  0x4a   :  { %2662 = vmatpush1.bf16.msra.mxu1 %v3522_v47 }
  0x4b   :  { %185 = vmatmul.mubr.f32.vlgmr.msra.gmra.mrb[0].mxu0 %v3372_v0  ;;  %2696 = vmatprep.subr.bf16.mxu1 %v3443_v22 }
  0x4c   :  { %2666 = vmatpush1.bf16.msra.mxu0 %v3432_v8  ;;  %489 = vmatprep.mubr.f32.mxu0 %v3372_v0 }
  0x4d   :  { %2668 = vmatprep.subr.bf16.mxu0 %v3434_v9  ;;  %256 = vmatmul.mubr.f32.vlgmr.msra.gmra.mrb[0].mxu1 %v3372_v0 }
  0x4e   :  { %2698 = vmatpush1.bf16.msra.mxu1 %v3445_v25  ;;  %560 = vmatprep.mubr.f32.mxu1 %v3372_v0 }
  0x4f   :  { %2700 = vmatprep.subr.bf16.mxu1 %v3455_v33 }
  0x50   :  { %2670 = vmatpush1.bf16.msra.mxu0 %v3438_v14 }
  0x51   :  { %2672 = vmatprep.subr.bf16.mxu0 %v3441_v17 }
  0x52   :  { %2702 = vmatpush1.bf16.msra.mxu1 %v3457_v37 }
  0x53   :  { %2704 = vmatprep.subr.bf16.mxu1 %v3463_v45 }
  0x54   :  { %2674 = vmatpush1.bf16.msra.mxu0 %v3448_v26 }
  0x55   :  { %2676 = vmatprep.subr.bf16.mxu0 %v3452_v30 }
  0x56   :  { %2706 = vmatpush1.bf16.msra.mxu1 %v3469_v48 }
  0x57   :  { %2708 = vmatprep.subr.bf16.mxu1 %v3472_v52 }
  0x58   :  { %2678 = vmatpush1.bf16.msra.mxu0 %v3461_v42 }
  0x59   :  { %2680 = vmatprep.subr.bf16.mxu0 %v3466_v46 }
  0x5a   :  { %2710 = vmatpush1.bf16.msra.mxu1 %v3481_v62 }
  0x5b   :  { %2712 = vmatprep.subr.bf16.mxu1 %v3484_v1 }
  0x5c   :  { %2682 = vmatpush1.bf16.msra.mxu0 %v3475_v55 }
  0x5d   :  { %2684 = vmatprep.subr.bf16.mxu0 %v3478_v58 }
  0x5e   :  { %2714 = vmatpush1.bf16.msra.mxu1 %v3493_v15 }
  0x5f   :  { %2716 = vmatprep.subr.bf16.mxu1 %v3496_v18 }
  0x60   :  { %2686 = vmatpush1.bf16.msra.mxu0 %v3487_v7 }
  0x61   :  { %2688 = vmatprep.subr.bf16.mxu0 %v3490_v10 }
  0x62   :  { %2718 = vmatpush1.bf16.msra.mxu1 %v3505_v31 }
  0x63   :  { %2720 = vmatprep.subr.bf16.mxu1 %v3508_v32 }
  0x64   :  { %2690 = vmatpush1.bf16.msra.mxu0 %v3499_v24 }
  0x65   :  { %2692 = vmatprep.subr.bf16.mxu0 %v3502_v27 }
  0x66   :  { %2722 = vmatpush1.bf16.msra.mxu1 %v3515_v40 }
  0x67   :  { %2724 = vmatprep.subr.bf16.mxu1 %v3518_v41 }
  0x68   :  { %2694 = vmatpush1.bf16.msra.mxu0 %v3511_v39 }
  0x69   :  { %2728 = vmatprep.subr.bf16.mxu0 %v3430_v4 }
  0x6a   :  { %2726 = vmatpush1.bf16.msra.mxu1 %v3522_v47 }
  0x6b   :  { %2760 = vmatprep.subr.bf16.mxu1 %v3443_v22 }
 0x11e   :  { %v186_v51 = vpop.f32.mrb[0].mxu0 }
 0x11f   :  { %v262_v53 = vadd.f32 %v186_v51, %v52_v49  ;;  %v188_v54 = vpop.f32.mrb[1].mxu0 }
 0x120   :  { %v263_v56 = vadd.f32 %v188_v54, %v53_v50  ;;  %v257_v61 = vpop.f32.mrb[0].mxu1  ;;  %v3567_v50 = vsub.s32 %v294_v43, %v296_v44 }
 0x121   :  { %v2543_v57 = vmul.f32 -1.442695, %v262_v53  ;;  %v259_v63 = vpop.f32.mrb[1].mxu1  ;;  %v264_v5 = vadd.f32 %v257_v61, %v54_v2 }
 0x122   :  { %v2544_v59 = vmul.f32 -1.442695, %v263_v56  ;;  %v265_v4 = vadd.f32 %v259_v63, %v55_v60 }
 0x123   :  { %3122 = vpow2.f32 %v2543_v57 }
 0x124   :  { %3124 = vpow2.f32 %v2544_v59  ;;  %v2545_v3 = vmul.f32 -1.442695, %v265_v4 }
 0x126   :  { %3126 = vpow2.f32 %v2545_v3 }
 0x127   :  { %3128 = vtanh.f32 %v264_v5 }
 0x12d   :  { %v3123_v6 = vpop.eup %3122 }
 0x12e   :  { %v3125_v11 = vpop.eup %3124  ;;  %v269_v12 = vadd.f32 1.0, %v3123_v6 }
 0x12f   :  { %v275_v13 = vadd.f32 1.0, %v3125_v11 }
 0x130   :  { %3130 = vrcp.f32 %v269_v12  ;;  %v3127_v16 = vpop.eup %3126 }
 0x131   :  { %3132 = vrcp.f32 %v275_v13  ;;  %v3129_v19 = vpop.eup %3128  ;;  %v282_v21 = vadd.f32 1.0, %v3127_v16 }
 0x133   :  { %3134 = vrcp.f32 %v282_v21 }
 0x13a   :  { %v3131_v20 = vpop.eup %3130 }
 0x13b   :  { %v3133_v23 = vpop.eup %3132  ;;  %v286_v28 = vmul.f32 %v3131_v20, %v3129_v19 }
 0x13c   :  { %v285_v29 = vmul.f32 0.0, %v3133_v23 }
 0x13d   :  { %v3135_v49 = vpop.eup %3134 }
 0x13e   :  { %v3564_v34 = vadd.f32 %v286_v28, %v285_v29 }
 0x140   :  { %3136 = vtanh.f32 %v3564_v34 }
 0x14a   :  { %v3137_v51 = vpop.eup %3136 }
 0x14b   :  { %v289_v53 = vmul.f32 %v3137_v51, %v3135_v49 }
 0x14d   :  { %v291_v54 = vcombine.high %v289_v53, %v289_v53  ;;  %v298_v56 = vrot.slane %v289_v53, %v3567_v50  ;;  %490 = vmatmul.mubr.f32.vlgmr.msra.gmra.mrb[2].mxu0 %v289_v53  ;;  %561 = vmatmul.mubr.f32.vlgmr.msra.gmra.mrb[2].mxu1 %v289_v53 }
 0x14e   :  { %2730 = vmatpush1.bf16.msra.mxu0 %v3432_v8  ;;  %2762 = vmatpush1.bf16.msra.mxu1 %v3445_v25 }
 0x14f   :  { %v305_v57 = vrot.slane %v291_v54, %v3567_v50  ;;  %v306_v59 = vcombine.high %v298_v56, %v298_v56  ;;  %v314_v60 = vrot.slane %v298_v56, %v3567_v50  ;;  %2546 = vst.sshfl [vmem:[#allocation9] sm:$0x1 pattern:$0x73625140] %v298_v56  ;;  %2732 = vmatprep.subr.bf16.mxu0 %v3434_v9 }
 0x150   :  { %2764 = vmatprep.subr.bf16.mxu1 %v3455_v33  ;;  %794 = vmatprep.mubr.f32.mxu0 %v3372_v0 }
 0x151   :  { %865 = vmatprep.mubr.f32.mxu1 %v3372_v0  ;;  %v307_v61 = vcombine.high %v305_v57, %v305_v57  ;;  %v321_v63 = vrot.slane %v305_v57, %v3567_v50  ;;  %v328_v8 = vrot.slane %v306_v59, %v3567_v50  ;;  %v336_v4 = vcombine.high %v314_v60, %v314_v60  ;;  %v975_v60 = vld [vmem:[#allocation7 + $0x20] sm:$0xff] }
 0x152   :  { %2547 = vst.sshfl [vmem:[#allocation9 + $0x8] sm:$0x1 pattern:$0x73625140] %v306_v59  ;;  %2734 = vmatpush1.bf16.msra.mxu0 %v3438_v14  ;;  %2766 = vmatpush1.bf16.msra.mxu1 %v3457_v37  ;;  %v357_v14 = vld [vmem:[#allocation4 + $0x20] sm:$0xff] }
 0x153   :  { %2548 = vst.sshfl [vmem:[#allocation9 + $0x20] sm:$0x1 pattern:$0x73625140] %v305_v57  ;;  %v335_v9 = vrot.slane %v307_v61, %v3567_v50  ;;  %v337_v2 = vcombine.high %v321_v63, %v321_v63  ;;  %v338_v3 = vcombine.high %v328_v8, %v328_v8  ;;  %350 = vst [vmem:[#allocation9 + $0x10] sm:$0x1] %v336_v4  ;;  %2736 = vmatprep.subr.bf16.mxu0 %v3441_v17 }
 0x154   :  { %2549 = vst.sshfl [vmem:[#allocation9 + $0x28] sm:$0x1 pattern:$0x73625140] %v307_v61  ;;  %2768 = vmatprep.subr.bf16.mxu1 %v3463_v45  ;;  %v358_v17 = vld [vmem:[#allocation4 + $0x28] sm:$0xff] }
 0x155   :  { %v339_v5 = vcombine.high %v335_v9, %v335_v9  ;;  %351 = vst [vmem:[#allocation9 + $0x18] sm:$0x1] %v338_v3  ;;  %354 = vst [vmem:[#allocation9 + $0x30] sm:$0x1] %v337_v2  ;;  %v976_v57 = vld [vmem:[#allocation7 + $0x28] sm:$0xff]  ;;  %v987_v9 = vld [vmem:[#allocation7 + $0x80] sm:$0xff] }
 0x156   :  { %2738 = vmatpush1.bf16.msra.mxu0 %v3448_v26  ;;  %2770 = vmatpush1.bf16.msra.mxu1 %v3469_v48  ;;  %v992_v8 = vld [vmem:[#allocation7 + $0xa8] sm:$0xff]  ;;  %v991_v2 = vld [vmem:[#allocation7 + $0xa0] sm:$0xff] }
 0x157   :  { %355 = vst [vmem:[#allocation9 + $0x38] sm:$0x1] %v339_v5  ;;  %2740 = vmatprep.subr.bf16.mxu0 %v3452_v30  ;;  %2772 = vmatprep.subr.bf16.mxu1 %v3472_v52  ;;  %v3644_v3 = vpack.c.bf16 %v991_v2, %v987_v9  ;;  %v996_v5 = vld [vmem:[#allocation7 + $0xc8] sm:$0xff] }
 0x15a   :  { %2742 = vmatpush1.bf16.msra.mxu0 %v3461_v42  ;;  %2774 = vmatpush1.bf16.msra.mxu1 %v3481_v62 }
 0x15b   :  { %2744 = vmatprep.subr.bf16.mxu0 %v3466_v46  ;;  %2776 = vmatprep.subr.bf16.mxu1 %v3484_v1 }
 0x15e   :  { %2746 = vmatpush1.bf16.msra.mxu0 %v3475_v55  ;;  %2778 = vmatpush1.bf16.msra.mxu1 %v3493_v15 }
 0x15f   :  { %2748 = vmatprep.subr.bf16.mxu0 %v3478_v58  ;;  %2780 = vmatprep.subr.bf16.mxu1 %v3496_v18 }
 0x162   :  { %2750 = vmatpush1.bf16.msra.mxu0 %v3487_v7  ;;  %2782 = vmatpush1.bf16.msra.mxu1 %v3505_v31  ;;  %v359_v31 = vld [vmem:[#allocation4 + $0x30] sm:$0xff] }
 0x163   :  { %2752 = vmatprep.subr.bf16.mxu0 %v3490_v10  ;;  %2784 = vmatprep.subr.bf16.mxu1 %v3508_v32 }
 0x166   :  { %2754 = vmatpush1.bf16.msra.mxu0 %v3499_v24  ;;  %2786 = vmatpush1.bf16.msra.mxu1 %v3515_v40  ;;  %v360_v24 = vld [vmem:[#allocation4 + $0x38] sm:$0xff] }
 0x167   :  { %2756 = vmatprep.subr.bf16.mxu0 %v3502_v27  ;;  %2788 = vmatprep.subr.bf16.mxu1 %v3518_v41 }
 0x16a   :  { %2758 = vmatpush1.bf16.msra.mxu0 %v3511_v39  ;;  %2790 = vmatpush1.bf16.msra.mxu1 %v3522_v47 }
 0x16b   :  { %2824 = vmatprep.subr.bf16.mxu1 %v3443_v22 }
 0x220   :  { %v491_v26 = vpop.f32.mrb[2].mxu0  ;;  %v562_v30 = vpop.f32.mrb[2].mxu1 }
 0x221   :  { %v567_v42 = vadd.f32 %v491_v26, %v357_v14  ;;  %v493_v46 = vpop.f32.mrb[3].mxu0  ;;  %v564_v55 = vpop.f32.mrb[3].mxu1  ;;  %v569_v39 = vadd.f32 %v562_v30, %v359_v31  ;;  %v1000_v14 = vld [vmem:[#allocation7 + $0xe8] sm:$0xff]  ;;  %v995_v26 = vld [vmem:[#allocation7 + $0xc0] sm:$0xff] }
 0x222   :  { %v568_v58 = vadd.f32 %v493_v46, %v358_v17  ;;  %v570_v27 = vadd.f32 %v564_v55, %v360_v24  ;;  %v3648_v17 = vpack.c.bf16 %v1000_v14, %v996_v5  ;;  %v999_v30 = vld [vmem:[#allocation7 + $0xe0] sm:$0xff]  ;;  %v1004_v46 = vld [vmem:[#allocation7 + $0x108] sm:$0xff]  ;;  %v665_v5 = vld [vmem:[#allocation4 + $0x58] sm:$0xff] }
 0x223   :  { %v2550_v7 = vmul.f32 -1.442695, %v567_v42  ;;  %v3650_v42 = vpack.c.bf16 %v999_v30, %v995_v26  ;;  %v1008_v55 = vld [vmem:[#allocation7 + $0x128] sm:$0xff]  ;;  %v664_v26 = vld [vmem:[#allocation4 + $0x50] sm:$0xff] }
 0x224   :  { %v2551_v10 = vmul.f32 -1.442695, %v568_v58  ;;  %v2552_v32 = vmul.f32 -1.442695, %v570_v27  ;;  %v3654_v58 = vpack.c.bf16 %v1008_v55, %v1004_v46  ;;  %v1012_v27 = vld [vmem:[#allocation7 + $0x148] sm:$0xff] }
 0x225   :  { %3138 = vpow2.f32 %v2550_v7  ;;  %v1003_v7 = vld [vmem:[#allocation7 + $0x100] sm:$0xff]  ;;  %v1016_v31 = vld [vmem:[#allocation7 + $0x168] sm:$0xff] }
 0x226   :  { %3140 = vpow2.f32 %v2551_v10  ;;  %v1007_v10 = vld [vmem:[#allocation7 + $0x120] sm:$0xff] }
 0x227   :  { %3142 = vpow2.f32 %v2552_v32  ;;  %v3656_v24 = vpack.c.bf16 %v1007_v10, %v1003_v7  ;;  %v1011_v32 = vld [vmem:[#allocation7 + $0x140] sm:$0xff] }
 0x228   :  { %3144 = vtanh.f32 %v569_v39  ;;  %v3660_v39 = vpack.c.bf16 %v1016_v31, %v1012_v27 }
 0x22f   :  { %v3139_v40 = vpop.eup %3138 }
 0x230   :  { %v3141_v41 = vpop.eup %3140  ;;  %v574_v22 = vadd.f32 1.0, %v3139_v40  ;;  %v1015_v40 = vld [vmem:[#allocation7 + $0x160] sm:$0xff] }
 0x231   :  { %v580_v47 = vadd.f32 1.0, %v3141_v41  ;;  %v3143_v6 = vpop.eup %3142  ;;  %v1013_v41 = vld [vmem:[#allocation7 + $0x150] sm:$0xff] }
 0x232   :  { %3146 = vrcp.f32 %v574_v22  ;;  %v3145_v11 = vpop.eup %3144  ;;  %v587_v19 = vadd.f32 1.0, %v3143_v6  ;;  %v1017_v22 = vld [vmem:[#allocation7 + $0x170] sm:$0xff] }
 0x233   :  { %3148 = vrcp.f32 %v580_v47  ;;  %v3662_v47 = vpack.c.bf16 %v1015_v40, %v1011_v32  ;;  %v3664_v6 = vpack.c.bf16 %v1017_v22, %v1013_v41 }
 0x234   :  { %3150 = vrcp.f32 %v587_v19  ;;  %v1026_v19 = vld [vmem:[#allocation7 + $0x1b8] sm:$0xff] }
 0x23c   :  { %v3147_v12 = vpop.eup %3146 }
 0x23d   :  { %v3149_v13 = vpop.eup %3148  ;;  %v591_v16 = vmul.f32 %v3147_v12, %v3145_v11  ;;  %v1020_v11 = vld [vmem:[#allocation7 + $0x188] sm:$0xff] }
 0x23e   :  { %v590_v20 = vmul.f32 %v3149_v13, %v3564_v34  ;;  %v3151_v23 = vpop.eup %3150  ;;  %v1024_v12 = vld [vmem:[#allocation7 + $0x1a8] sm:$0xff]  ;;  %v1022_v13 = vld [vmem:[#allocation7 + $0x198] sm:$0xff] }
 0x240   :  { %v3609_v21 = vadd.f32 %v591_v16, %v590_v20  ;;  %v3667_v16 = vpack.c.bf16 %v1024_v12, %v1020_v11  ;;  %v1019_v20 = vld [vmem:[#allocation7 + $0x180] sm:$0xff] }
 0x242   :  { %3152 = vtanh.f32 %v3609_v21 }
 0x24c   :  { %v3153_v28 = vpop.eup %3152 }
 0x24d   :  { %v594_v29 = vmul.f32 %v3153_v28, %v3151_v23  ;;  %v1023_v23 = vld [vmem:[#allocation7 + $0x1a0] sm:$0xff]  ;;  %v3670_v28 = vpack.c.bf16 %v1026_v19, %v1022_v13 }
 0x24f   :  { %v596_v35 = vcombine.high %v594_v29, %v594_v29  ;;  %v603_v36 = vrot.slane %v594_v29, %v3567_v50  ;;  %795 = vmatmul.mubr.f32.vlgmr.msra.gmra.mrb[4].mxu0 %v594_v29  ;;  %866 = vmatmul.mubr.f32.vlgmr.msra.gmra.mrb[4].mxu1 %v594_v29  ;;  %v1021_v29 = vld [vmem:[#allocation7 + $0x190] sm:$0xff] }
 0x250   :  { %2826 = vmatpush1.bf16.msra.mxu1 %v3445_v25  ;;  %1099 = vmatprep.mubr.f32.mxu0 %v3372_v0 }
 0x251   :  { %v610_v38 = vrot.slane %v596_v35, %v3567_v50  ;;  %v611_v34 = vcombine.high %v603_v36, %v603_v36  ;;  %v619_v43 = vrot.slane %v603_v36, %v3567_v50  ;;  %2553 = vst.sshfl [vmem:[#allocation9 + $0x1] sm:$0x1 pattern:$0x73625140] %v603_v36  ;;  %2828 = vmatprep.subr.bf16.mxu1 %v3455_v33  ;;  %v1025_v35 = vld [vmem:[#allocation7 + $0x1b0] sm:$0xff]  ;;  %v1028_v36 = vld [vmem:[#allocation7 + $0x1c8] sm:$0xff] }
 0x252   :  { %1170 = vmatprep.mubr.f32.mxu1 %v3372_v0 }
 0x253   :  { %v612_v44 = vcombine.high %v610_v38, %v610_v38  ;;  %v626_v49 = vrot.slane %v610_v38, %v3567_v50  ;;  %v633_v51 = vrot.slane %v611_v34, %v3567_v50  ;;  %v641_v53 = vcombine.high %v619_v43, %v619_v43  ;;  %2554 = vst.sshfl [vmem:[#allocation9 + $0x9] sm:$0x1 pattern:$0x73625140] %v611_v34  ;;  %v1032_v43 = vld [vmem:[#allocation7 + $0x1e8] sm:$0xff] }
 0x254   :  { %2555 = vst.sshfl [vmem:[#allocation9 + $0x21] sm:$0x1 pattern:$0x73625140] %v610_v38  ;;  %2830 = vmatpush1.bf16.msra.mxu1 %v3457_v37  ;;  %v972_v37 = vld [vmem:[#allocation7 + $0x8] sm:$0xff]  ;;  %v3673_v38 = vpack.c.bf16 %v1023_v23, %v1019_v20  ;;  %v3675_v34 = vpack.c.bf16 %v1025_v35, %v1021_v29 }
 0x255   :  { %v640_v25 = vrot.slane %v612_v44, %v3567_v50  ;;  %v642_v54 = vcombine.high %v626_v49, %v626_v49  ;;  %v643_v56 = vcombine.high %v633_v51, %v633_v51  ;;  %655 = vst [vmem:[#allocation9 + $0x11] sm:$0x1] %v641_v53  ;;  %2556 = vst.sshfl [vmem:[#allocation9 + $0x29] sm:$0x1 pattern:$0x73625140] %v612_v44  ;;  %2832 = vmatprep.subr.bf16.mxu1 %v3463_v45 }
 0x256   :  { %v3630_v59 = vpack.c.bf16 %v976_v57, %v972_v37  ;;  %v971_v45 = vld [vmem:[#allocation7] sm:$0xff]  ;;  %v1030_v44 = vld [vmem:[#allocation7 + $0x1d8] sm:$0xff]  ;;  %v3679_v51 = vpack.c.bf16 %v1032_v43, %v1028_v36 }
 0x257   :  { %v644_v33 = vcombine.high %v640_v25, %v640_v25  ;;  %656 = vst [vmem:[#allocation9 + $0x19] sm:$0x1] %v643_v56  ;;  %659 = vst [vmem:[#allocation9 + $0x31] sm:$0x1] %v642_v54  ;;  %v3632_v61 = vpack.c.bf16 %v975_v60, %v971_v45  ;;  %v1034_v49 = vld [vmem:[#allocation7 + $0x1f8] sm:$0xff]  ;;  %v1027_v25 = vld [vmem:[#allocation7 + $0x1c0] sm:$0xff] }
 0x258   :  { %2834 = vmatpush1.bf16.msra.mxu1 %v3469_v48  ;;  %2792 = vmatprep.subr.bf16.mxu0 %v3630_v59  ;;  %v980_v48 = vld [vmem:[#allocation7 + $0x48] sm:$0xff]  ;;  %v3681_v53 = vpack.c.bf16 %v1034_v49, %v1030_v44  ;;  %v1031_v54 = vld [vmem:[#allocation7 + $0x1e0] sm:$0xff]  ;;  %v1029_v56 = vld [vmem:[#allocation7 + $0x1d0] sm:$0xff] }
 0x259   :  { %660 = vst [vmem:[#allocation9 + $0x39] sm:$0x1] %v644_v33  ;;  %2836 = vmatprep.subr.bf16.mxu1 %v3472_v52  ;;  %2794 = vmatpush1.bf16.msra.mxu0 %v3632_v61  ;;  %v984_v52 = vld [vmem:[#allocation7 + $0x68] sm:$0xff]  ;;  %v1033_v33 = vld [vmem:[#allocation7 + $0x1f0] sm:$0xff]  ;;  %v3688_v57 = vpack.c.bf16 %v1031_v54, %v1027_v25  ;;  %v662_v45 = vld [vmem:[#allocation4 + $0x40] sm:$0xff] }
 0x25a   :  { %v3684_v37 = vpack.c.bf16 %v1033_v33, %v1029_v56  ;;  %v663_v60 = vld [vmem:[#allocation4 + $0x48] sm:$0xff] }
 0x25c   :  { %2838 = vmatpush1.bf16.msra.mxu1 %v3481_v62  ;;  %v3636_v62 = vpack.c.bf16 %v984_v52, %v980_v48 }
 0x25d   :  { %2840 = vmatprep.subr.bf16.mxu1 %v3484_v1  ;;  %v979_v1 = vld [vmem:[#allocation7 + $0x40] sm:$0xff] }
 0x25e   :  { %2796 = vmatprep.subr.bf16.mxu0 %v3636_v62 }
 0x260   :  { %2842 = vmatpush1.bf16.msra.mxu1 %v3493_v15  ;;  %v983_v15 = vld [vmem:[#allocation7 + $0x60] sm:$0xff] }
 0x261   :  { %2844 = vmatprep.subr.bf16.mxu1 %v3496_v18  ;;  %v3638_v63 = vpack.c.bf16 %v983_v15, %v979_v1  ;;  %v988_v18 = vld [vmem:[#allocation7 + $0x88] sm:$0xff] }
 0x262   :  { %v3642_v4 = vpack.c.bf16 %v992_v8, %v988_v18 }
 0x263   :  { %2798 = vmatpush1.bf16.msra.mxu0 %v3638_v63 }
 0x264   :  { %2800 = vmatprep.subr.bf16.mxu0 %v3642_v4  ;;  %2846 = vmatpush1.bf16.msra.mxu1 %v3664_v6 }
 0x265   :  { %2848 = vmatprep.subr.bf16.mxu1 %v3670_v28 }
 0x267   :  { %2802 = vmatpush1.bf16.msra.mxu0 %v3644_v3 }
 0x268   :  { %2804 = vmatprep.subr.bf16.mxu0 %v3648_v17  ;;  %2850 = vmatpush1.bf16.msra.mxu1 %v3675_v34 }
 0x269   :  { %2852 = vmatprep.subr.bf16.mxu1 %v3681_v53 }
 0x26b   :  { %2806 = vmatpush1.bf16.msra.mxu0 %v3650_v42 }
 0x26c   :  { %2808 = vmatprep.subr.bf16.mxu0 %v3654_v58  ;;  %2854 = vmatpush1.bf16.msra.mxu1 %v3684_v37 }
 0x26f   :  { %2810 = vmatpush1.bf16.msra.mxu0 %v3656_v24 }
 0x270   :  { %2812 = vmatprep.subr.bf16.mxu0 %v3660_v39 }
 0x273   :  { %2814 = vmatpush1.bf16.msra.mxu0 %v3662_v47 }
 0x274   :  { %2816 = vmatprep.subr.bf16.mxu0 %v3667_v16 }
 0x277   :  { %2818 = vmatpush1.bf16.msra.mxu0 %v3673_v38 }
 0x278   :  { %2820 = vmatprep.subr.bf16.mxu0 %v3679_v51 }
 0x27b   :  { %2822 = vmatpush1.bf16.msra.mxu0 %v3688_v57 }
 0x27c   :  { %2856 = vmatprep.subr.bf16.mxu0 %v3630_v59 }
 0x322   :  { %v796_v48 = vpop.f32.mrb[4].mxu0  ;;  %v867_v52 = vpop.f32.mrb[4].mxu1 }
 0x323   :  { %v872_v1 = vadd.f32 %v796_v48, %v662_v45  ;;  %v798_v15 = vpop.f32.mrb[5].mxu0  ;;  %v869_v18 = vpop.f32.mrb[5].mxu1  ;;  %v874_v46 = vadd.f32 %v867_v52, %v664_v26  ;;  %v1279_v48 = vld [vmem:[#allocation7 + $0x18] sm:$0xff]  ;;  %v1290_v26 = vld [vmem:[#allocation7 + $0x70] sm:$0xff] }
 0x324   :  { %v873_v8 = vadd.f32 %v798_v15, %v663_v60  ;;  %v875_v14 = vadd.f32 %v869_v18, %v665_v5  ;;  %v1283_v52 = vld [vmem:[#allocation7 + $0x38] sm:$0xff]  ;;  %v1278_v15 = vld [vmem:[#allocation7 + $0x10] sm:$0xff] }
 0x325   :  { %v2557_v9 = vmul.f32 -1.442695, %v872_v1  ;;  %v3722_v1 = vpack.c.bf16 %v1283_v52, %v1279_v48  ;;  %v1282_v18 = vld [vmem:[#allocation7 + $0x30] sm:$0xff] }
 0x326   :  { %v2558_v2 = vmul.f32 -1.442695, %v873_v8  ;;  %v2559_v30 = vmul.f32 -1.442695, %v875_v14  ;;  %v3724_v8 = vpack.c.bf16 %v1282_v18, %v1278_v15  ;;  %v1286_v14 = vld [vmem:[#allocation7 + $0x50] sm:$0xff]  ;;  %v970_v15 = vld [vmem:[#allocation4 + $0x78] sm:$0xff] }
 0x327   :  { %3154 = vpow2.f32 %v2557_v9  ;;  %2888 = vmatprep.subr.bf16.mxu1 %v3722_v1  ;;  %v1287_v9 = vld [vmem:[#allocation7 + $0x58] sm:$0xff] }
 0x328   :  { %3156 = vpow2.f32 %v2558_v2  ;;  %v1291_v2 = vld [vmem:[#allocation7 + $0x78] sm:$0xff] }
 0x329   :  { %3158 = vpow2.f32 %v2559_v30  ;;  %v3728_v5 = vpack.c.bf16 %v1291_v2, %v1287_v9  ;;  %v3730_v30 = vpack.c.bf16 %v1290_v26, %v1286_v14  ;;  %v969_v9 = vld [vmem:[#allocation4 + $0x70] sm:$0xff] }
 0x32a   :  { %3160 = vtanh.f32 %v874_v46  ;;  %v1299_v46 = vld [vmem:[#allocation7 + $0xb8] sm:$0xff] }
 0x331   :  { %v3155_v55 = vpop.eup %3154 }
 0x332   :  { %v3157_v7 = vpop.eup %3156  ;;  %v879_v10 = vadd.f32 1.0, %v3155_v55 }
 0x333   :  { %v885_v27 = vadd.f32 1.0, %v3157_v7  ;;  %v3159_v31 = vpop.eup %3158  ;;  %v1294_v7 = vld [vmem:[#allocation7 + $0x90] sm:$0xff] }
 0x334   :  { %3162 = vrcp.f32 %v879_v10  ;;  %v3161_v32 = vpop.eup %3160  ;;  %v892_v11 = vadd.f32 1.0, %v3159_v31  ;;  %v1298_v10 = vld [vmem:[#allocation7 + $0xb0] sm:$0xff]  ;;  %v1303_v31 = vld [vmem:[#allocation7 + $0xd8] sm:$0xff] }
 0x335   :  { %3164 = vrcp.f32 %v885_v27  ;;  %v3736_v27 = vpack.c.bf16 %v1298_v10, %v1294_v7 }
 0x336   :  { %3166 = vrcp.f32 %v892_v11 }
 0x33e   :  { %v3163_v40 = vpop.eup %3162 }
 0x33f   :  { %v3165_v41 = vpop.eup %3164  ;;  %v896_v22 = vmul.f32 %v3163_v40, %v3161_v32  ;;  %v1307_v32 = vld [vmem:[#allocation7 + $0xf8] sm:$0xff] }
 0x340   :  { %v895_v12 = vmul.f32 %v3165_v41, %v3609_v21  ;;  %v3167_v19 = vpop.eup %3166  ;;  %v3740_v40 = vpack.c.bf16 %v1307_v32, %v1303_v31  ;;  %v1302_v41 = vld [vmem:[#allocation7 + $0xd0] sm:$0xff] }
 0x342   :  { %v3695_v13 = vadd.f32 %v896_v22, %v895_v12  ;;  %v1306_v22 = vld [vmem:[#allocation7 + $0xf0] sm:$0xff]  ;;  %v1311_v12 = vld [vmem:[#allocation7 + $0x118] sm:$0xff] }
 0x343   :  { %v3742_v11 = vpack.c.bf16 %v1306_v22, %v1302_v41 }
 0x344   :  { %3168 = vtanh.f32 %v3695_v13 }
 0x34e   :  { %v3169_v20 = vpop.eup %3168 }
 0x34f   :  { %v899_v23 = vmul.f32 %v3169_v20, %v3167_v19  ;;  %v1315_v19 = vld [vmem:[#allocation7 + $0x138] sm:$0xff] }
 0x350   :  { %v3746_v20 = vpack.c.bf16 %v1315_v19, %v1311_v12 }
 0x351   :  { %v901_v29 = vcombine.high %v899_v23, %v899_v23  ;;  %v908_v35 = vrot.slane %v899_v23, %v3567_v50  ;;  %1100 = vmatmul.mubr.f32.vlgmr.msra.gmra.mrb[6].mxu0 %v899_v23  ;;  %1171 = vmatmul.mubr.f32.vlgmr.msra.gmra.mrb[6].mxu1 %v899_v23  ;;  %v1310_v23 = vld [vmem:[#allocation7 + $0x110] sm:$0xff] }
 0x352   :  { %2858 = vmatpush1.bf16.msra.mxu0 %v3632_v61  ;;  %1404 = vmatprep.mubr.f32.mxu0 %v3372_v0 }
 0x353   :  { %v915_v36 = vrot.slane %v901_v29, %v3567_v50  ;;  %v916_v21 = vcombine.high %v908_v35, %v908_v35  ;;  %v924_v43 = vrot.slane %v908_v35, %v3567_v50  ;;  %2560 = vst.sshfl [vmem:[#allocation9 + $0x2] sm:$0x1 pattern:$0x73625140] %v908_v35  ;;  %2860 = vmatprep.subr.bf16.mxu0 %v3636_v62  ;;  %v1314_v29 = vld [vmem:[#allocation7 + $0x130] sm:$0xff] }
 0x354   :  { %1475 = vmatprep.mubr.f32.mxu1 %v3372_v0  ;;  %2890 = vmatpush1.bf16.msra.mxu1 %v3724_v8  ;;  %v3748_v35 = vpack.c.bf16 %v1314_v29, %v1310_v23 }
 0x355   :  { %v917_v44 = vcombine.high %v915_v36, %v915_v36  ;;  %v931_v49 = vrot.slane %v915_v36, %v3567_v50  ;;  %v938_v25 = vrot.slane %v916_v21, %v3567_v50  ;;  %v946_v54 = vcombine.high %v924_v43, %v924_v43  ;;  %2561 = vst.sshfl [vmem:[#allocation9 + $0xa] sm:$0x1 pattern:$0x73625140] %v916_v21  ;;  %v1323_v21 = vld [vmem:[#allocation7 + $0x178] sm:$0xff] }
 0x356   :  { %2562 = vst.sshfl [vmem:[#allocation9 + $0x22] sm:$0x1 pattern:$0x73625140] %v915_v36  ;;  %2862 = vmatpush1.bf16.msra.mxu0 %v3638_v63  ;;  %2892 = vmatprep.subr.bf16.mxu1 %v3728_v5  ;;  %v1319_v36 = vld [vmem:[#allocation7 + $0x158] sm:$0xff] }
 0x357   :  { %v945_v56 = vrot.slane %v917_v44, %v3567_v50  ;;  %v947_v33 = vcombine.high %v931_v49, %v931_v49  ;;  %v948_v45 = vcombine.high %v938_v25, %v938_v25  ;;  %960 = vst [vmem:[#allocation9 + $0x12] sm:$0x1] %v946_v54  ;;  %2563 = vst.sshfl [vmem:[#allocation9 + $0x2a] sm:$0x1 pattern:$0x73625140] %v917_v44  ;;  %2864 = vmatprep.subr.bf16.mxu0 %v3642_v4 }
 0x358   :  { %2894 = vmatpush1.bf16.msra.mxu1 %v3730_v30  ;;  %v3752_v43 = vpack.c.bf16 %v1323_v21, %v1319_v36  ;;  %v967_v44 = vld [vmem:[#allocation4 + $0x60] sm:$0xff]  ;;  %v968_v49 = vld [vmem:[#allocation4 + $0x68] sm:$0xff] }
 0x359   :  { %v949_v60 = vcombine.high %v945_v56, %v945_v56  ;;  %961 = vst [vmem:[#allocation9 + $0x1a] sm:$0x1] %v948_v45  ;;  %964 = vst [vmem:[#allocation9 + $0x32] sm:$0x1] %v947_v33 }
 0x35a   :  { %2866 = vmatpush1.bf16.msra.mxu0 %v3644_v3 }
 0x35b   :  { %965 = vst [vmem:[#allocation9 + $0x3a] sm:$0x1] %v949_v60  ;;  %2868 = vmatprep.subr.bf16.mxu0 %v3648_v17 }
 0x35e   :  { %2870 = vmatpush1.bf16.msra.mxu0 %v3650_v42 }
 0x35f   :  { %2872 = vmatprep.subr.bf16.mxu0 %v3654_v58 }
 0x362   :  { %2874 = vmatpush1.bf16.msra.mxu0 %v3656_v24 }
 0x363   :  { %2876 = vmatprep.subr.bf16.mxu0 %v3660_v39 }
 0x366   :  { %2878 = vmatpush1.bf16.msra.mxu0 %v3662_v47 }
 0x367   :  { %2880 = vmatprep.subr.bf16.mxu0 %v3667_v16 }
 0x36a   :  { %2882 = vmatpush1.bf16.msra.mxu0 %v3673_v38 }
 0x36b   :  { %2884 = vmatprep.subr.bf16.mxu0 %v3679_v51 }
 0x36e   :  { %2886 = vmatpush1.bf16.msra.mxu0 %v3688_v57 }
 0x36f   :  { %2920 = vmatprep.subr.bf16.mxu0 %v3630_v59  ;;  %v1295_v59 = vld [vmem:[#allocation7 + $0x98] sm:$0xff] }
 0x370   :  { %v3734_v55 = vpack.c.bf16 %v1299_v46, %v1295_v59 }
 0x372   :  { %2896 = vmatprep.subr.bf16.mxu1 %v3734_v55 }
 0x373   :  { %2898 = vmatpush1.bf16.msra.mxu1 %v3736_v27 }
 0x374   :  { %2900 = vmatprep.subr.bf16.mxu1 %v3740_v40 }
 0x377   :  { %2902 = vmatpush1.bf16.msra.mxu1 %v3742_v11 }
 0x378   :  { %2904 = vmatprep.subr.bf16.mxu1 %v3746_v20 }
 0x37b   :  { %2906 = vmatpush1.bf16.msra.mxu1 %v3748_v35 }
 0x37c   :  { %2908 = vmatprep.subr.bf16.mxu1 %v3752_v43 }
 0x37f   :  { %2910 = vmatpush1.bf16.msra.mxu1 %v3664_v6 }
 0x380   :  { %2912 = vmatprep.subr.bf16.mxu1 %v3670_v28 }
 0x383   :  { %2914 = vmatpush1.bf16.msra.mxu1 %v3675_v34 }
 0x384   :  { %2916 = vmatprep.subr.bf16.mxu1 %v3681_v53 }
 0x387   :  { %2918 = vmatpush1.bf16.msra.mxu1 %v3684_v37 }
 0x388   :  { %2952 = vmatprep.subr.bf16.mxu1 %v3722_v1 }
 0x424   :  { %v1101_v25 = vpop.f32.mrb[6].mxu0  ;;  %v1172_v54 = vpop.f32.mrb[6].mxu1 }
 0x425   :  { %v1177_v56 = vadd.f32 %v1101_v25, %v967_v44  ;;  %v1103_v33 = vpop.f32.mrb[7].mxu0  ;;  %v1174_v45 = vpop.f32.mrb[7].mxu1  ;;  %v1179_v14 = vadd.f32 %v1172_v54, %v969_v9 }
 0x426   :  { %v1178_v60 = vadd.f32 %v1103_v33, %v968_v49  ;;  %v1180_v18 = vadd.f32 %v1174_v45, %v970_v15 }
 0x427   :  { %v2564_v48 = vmul.f32 -1.442695, %v1177_v56 }
 0x428   :  { %v2565_v52 = vmul.f32 -1.442695, %v1178_v60  ;;  %v2566_v2 = vmul.f32 -1.442695, %v1180_v18 }
 0x429   :  { %3170 = vpow2.f32 %v2564_v48 }
 0x42a   :  { %3172 = vpow2.f32 %v2565_v52 }
 0x42b   :  { %3174 = vpow2.f32 %v2566_v2 }
 0x42c   :  { %3176 = vtanh.f32 %v1179_v14 }
 0x433   :  { %v3171_v26 = vpop.eup %3170 }
 0x434   :  { %v3173_v59 = vpop.eup %3172  ;;  %v1184_v46 = vadd.f32 1.0, %v3171_v26 }
 0x435   :  { %v1190_v7 = vadd.f32 1.0, %v3173_v59  ;;  %v3175_v10 = vpop.eup %3174 }
 0x436   :  { %3178 = vrcp.f32 %v1184_v46  ;;  %v3177_v31 = vpop.eup %3176  ;;  %v1197_v12 = vadd.f32 1.0, %v3175_v10 }
 0x437   :  { %3180 = vrcp.f32 %v1190_v7 }
 0x438   :  { %3182 = vrcp.f32 %v1197_v12 }
 0x440   :  { %v3179_v32 = vpop.eup %3178 }
 0x441   :  { %v3181_v41 = vpop.eup %3180  ;;  %v1201_v22 = vmul.f32 %v3179_v32, %v3177_v31 }
 0x442   :  { %v1200_v19 = vmul.f32 %v3181_v41, %v3695_v13  ;;  %v3183_v29 = vpop.eup %3182 }
 0x444   :  { %v3762_v23 = vadd.f32 %v1201_v22, %v1200_v19 }
 0x446   :  { %3184 = vtanh.f32 %v3762_v23 }
 0x450   :  { %v3185_v36 = vpop.eup %3184 }
 0x451   :  { %v1204_v21 = vmul.f32 %v3185_v36, %v3183_v29 }
 0x453   :  { %v1206_v44 = vcombine.high %v1204_v21, %v1204_v21  ;;  %v1213_v49 = vrot.slane %v1204_v21, %v3567_v50  ;;  %1405 = vmatmul.mubr.f32.vlgmr.msra.gmra.mrb[8].mxu0 %v1204_v21  ;;  %1476 = vmatmul.mubr.f32.vlgmr.msra.gmra.mrb[8].mxu1 %v1204_v21 }
 0x454   :  { %2922 = vmatpush1.bf16.msra.mxu0 %v3632_v61  ;;  %2954 = vmatpush1.bf16.msra.mxu1 %v3724_v8 }
 0x455   :  { %v1220_v25 = vrot.slane %v1206_v44, %v3567_v50  ;;  %v1221_v13 = vcombine.high %v1213_v49, %v1213_v49  ;;  %v1229_v54 = vrot.slane %v1213_v49, %v3567_v50  ;;  %2567 = vst.sshfl [vmem:[#allocation9 + $0x3] sm:$0x1 pattern:$0x73625140] %v1213_v49  ;;  %2924 = vmatprep.subr.bf16.mxu0 %v3636_v62 }
 0x456   :  { %2956 = vmatprep.subr.bf16.mxu1 %v3728_v5  ;;  %1709 = vmatprep.mubr.f32.mxu0 %v3372_v0 }
 0x457   :  { %1780 = vmatprep.mubr.f32.mxu1 %v3372_v0  ;;  %v1222_v56 = vcombine.high %v1220_v25, %v1220_v25  ;;  %v1236_v33 = vrot.slane %v1220_v25, %v3567_v50  ;;  %v1243_v61 = vrot.slane %v1221_v13, %v3567_v50  ;;  %v1251_v45 = vcombine.high %v1229_v54, %v1229_v54  ;;  %v1890_v54 = vld [vmem:[#allocation7 + $0x20] sm:$0xff] }
 0x458   :  { %2568 = vst.sshfl [vmem:[#allocation9 + $0xb] sm:$0x1 pattern:$0x73625140] %v1221_v13  ;;  %2926 = vmatpush1.bf16.msra.mxu0 %v3638_v63  ;;  %2958 = vmatpush1.bf16.msra.mxu1 %v3730_v30  ;;  %v1272_v63 = vld [vmem:[#allocation4 + $0x80] sm:$0xff] }
 0x459   :  { %2569 = vst.sshfl [vmem:[#allocation9 + $0x23] sm:$0x1 pattern:$0x73625140] %v1220_v25  ;;  %v1250_v62 = vrot.slane %v1222_v56, %v3567_v50  ;;  %v1252_v60 = vcombine.high %v1236_v33, %v1236_v33  ;;  %v1253_v48 = vcombine.high %v1243_v61, %v1243_v61  ;;  %1265 = vst [vmem:[#allocation9 + $0x13] sm:$0x1] %v1251_v45  ;;  %2928 = vmatprep.subr.bf16.mxu0 %v3642_v4 }
 0x45a   :  { %2570 = vst.sshfl [vmem:[#allocation9 + $0x2b] sm:$0x1 pattern:$0x73625140] %v1222_v56  ;;  %2960 = vmatprep.subr.bf16.mxu1 %v3734_v55  ;;  %v1273_v4 = vld [vmem:[#allocation4 + $0x88] sm:$0xff] }
 0x45b   :  { %v1254_v52 = vcombine.high %v1250_v62, %v1250_v62  ;;  %1266 = vst [vmem:[#allocation9 + $0x1b] sm:$0x1] %v1253_v48  ;;  %1269 = vst [vmem:[#allocation9 + $0x33] sm:$0x1] %v1252_v60  ;;  %v1891_v25 = vld [vmem:[#allocation7 + $0x28] sm:$0xff]  ;;  %v1902_v62 = vld [vmem:[#allocation7 + $0x80] sm:$0xff] }
 0x45c   :  { %2930 = vmatpush1.bf16.msra.mxu0 %v3644_v3  ;;  %2962 = vmatpush1.bf16.msra.mxu1 %v3736_v27  ;;  %v1907_v61 = vld [vmem:[#allocation7 + $0xa8] sm:$0xff]  ;;  %v1906_v60 = vld [vmem:[#allocation7 + $0xa0] sm:$0xff] }
 0x45d   :  { %1270 = vst [vmem:[#allocation9 + $0x3b] sm:$0x1] %v1254_v52  ;;  %2932 = vmatprep.subr.bf16.mxu0 %v3648_v17  ;;  %2964 = vmatprep.subr.bf16.mxu1 %v3740_v40  ;;  %v3840_v48 = vpack.c.bf16 %v1906_v60, %v1902_v62  ;;  %v1911_v52 = vld [vmem:[#allocation7 + $0xc8] sm:$0xff] }
 0x460   :  { %2934 = vmatpush1.bf16.msra.mxu0 %v3650_v42  ;;  %2966 = vmatpush1.bf16.msra.mxu1 %v3742_v11 }
 0x461   :  { %2936 = vmatprep.subr.bf16.mxu0 %v3654_v58  ;;  %2968 = vmatprep.subr.bf16.mxu1 %v3746_v20 }
 0x464   :  { %2938 = vmatpush1.bf16.msra.mxu0 %v3656_v24  ;;  %2970 = vmatpush1.bf16.msra.mxu1 %v3748_v35 }
 0x465   :  { %2940 = vmatprep.subr.bf16.mxu0 %v3660_v39  ;;  %2972 = vmatprep.subr.bf16.mxu1 %v3752_v43 }
 0x468   :  { %2942 = vmatpush1.bf16.msra.mxu0 %v3662_v47  ;;  %2974 = vmatpush1.bf16.msra.mxu1 %v3664_v6 }
 0x469   :  { %2944 = vmatprep.subr.bf16.mxu0 %v3667_v16  ;;  %2976 = vmatprep.subr.bf16.mxu1 %v3670_v28  ;;  %v1275_v16 = vld [vmem:[#allocation4 + $0x98] sm:$0xff] }
 0x46c   :  { %2946 = vmatpush1.bf16.msra.mxu0 %v3673_v38  ;;  %2978 = vmatpush1.bf16.msra.mxu1 %v3675_v34  ;;  %v1274_v38 = vld [vmem:[#allocation4 + $0x90] sm:$0xff] }
 0x46d   :  { %2948 = vmatprep.subr.bf16.mxu0 %v3679_v51  ;;  %2980 = vmatprep.subr.bf16.mxu1 %v3681_v53 }
 0x470   :  { %2950 = vmatpush1.bf16.msra.mxu0 %v3688_v57  ;;  %2982 = vmatpush1.bf16.msra.mxu1 %v3684_v37 }
 0x471   :  { %3016 = vmatprep.subr.bf16.mxu1 %v3722_v1 }
 0x526   :  { %v1406_v3 = vpop.f32.mrb[8].mxu0  ;;  %v1477_v17 = vpop.f32.mrb[8].mxu1 }
 0x527   :  { %v1482_v42 = vadd.f32 %v1406_v3, %v1272_v63  ;;  %v1408_v58 = vpop.f32.mrb[9].mxu0  ;;  %v1479_v24 = vpop.f32.mrb[9].mxu1  ;;  %v1484_v51 = vadd.f32 %v1477_v17, %v1274_v38  ;;  %v1915_v63 = vld [vmem:[#allocation7 + $0xe8] sm:$0xff]  ;;  %v1910_v3 = vld [vmem:[#allocation7 + $0xc0] sm:$0xff] }
 0x528   :  { %v1483_v39 = vadd.f32 %v1408_v58, %v1273_v4  ;;  %v1485_v28 = vadd.f32 %v1479_v24, %v1275_v16  ;;  %v3844_v4 = vpack.c.bf16 %v1915_v63, %v1911_v52  ;;  %v1914_v17 = vld [vmem:[#allocation7 + $0xe0] sm:$0xff]  ;;  %v1919_v58 = vld [vmem:[#allocation7 + $0x108] sm:$0xff]  ;;  %v1580_v52 = vld [vmem:[#allocation4 + $0xb8] sm:$0xff] }
 0x529   :  { %v2571_v47 = vmul.f32 -1.442695, %v1482_v42  ;;  %v3846_v42 = vpack.c.bf16 %v1914_v17, %v1910_v3  ;;  %v1923_v24 = vld [vmem:[#allocation7 + $0x128] sm:$0xff]  ;;  %v1579_v3 = vld [vmem:[#allocation4 + $0xb0] sm:$0xff] }
 0x52a   :  { %v2572_v6 = vmul.f32 -1.442695, %v1483_v39  ;;  %v2573_v34 = vmul.f32 -1.442695, %v1485_v28  ;;  %v3850_v39 = vpack.c.bf16 %v1923_v24, %v1919_v58  ;;  %v1927_v28 = vld [vmem:[#allocation7 + $0x148] sm:$0xff] }
 0x52b   :  { %3186 = vpow2.f32 %v2571_v47  ;;  %v1918_v47 = vld [vmem:[#allocation7 + $0x100] sm:$0xff]  ;;  %v1931_v38 = vld [vmem:[#allocation7 + $0x168] sm:$0xff] }
 0x52c   :  { %3188 = vpow2.f32 %v2572_v6  ;;  %v1922_v6 = vld [vmem:[#allocation7 + $0x120] sm:$0xff] }
 0x52d   :  { %3190 = vpow2.f32 %v2573_v34  ;;  %v3852_v16 = vpack.c.bf16 %v1922_v6, %v1918_v47  ;;  %v1926_v34 = vld [vmem:[#allocation7 + $0x140] sm:$0xff] }
 0x52e   :  { %3192 = vtanh.f32 %v1484_v51  ;;  %v3856_v51 = vpack.c.bf16 %v1931_v38, %v1927_v28 }
 0x535   :  { %v3187_v53 = vpop.eup %3186 }
 0x536   :  { %v3189_v37 = vpop.eup %3188  ;;  %v1489_v57 = vadd.f32 1.0, %v3187_v53  ;;  %v1930_v53 = vld [vmem:[#allocation7 + $0x160] sm:$0xff] }
 0x537   :  { %v1495_v1 = vadd.f32 1.0, %v3189_v37  ;;  %v3191_v15 = vpop.eup %3190  ;;  %v1928_v37 = vld [vmem:[#allocation7 + $0x150] sm:$0xff] }
 0x538   :  { %3194 = vrcp.f32 %v1489_v57  ;;  %v3193_v18 = vpop.eup %3192  ;;  %v1502_v26 = vadd.f32 1.0, %v3191_v15  ;;  %v1932_v57 = vld [vmem:[#allocation7 + $0x170] sm:$0xff] }
 0x539   :  { %3196 = vrcp.f32 %v1495_v1  ;;  %v3858_v1 = vpack.c.bf16 %v1930_v53, %v1926_v34  ;;  %v3860_v15 = vpack.c.bf16 %v1932_v57, %v1928_v37 }
 0x53a   :  { %3198 = vrcp.f32 %v1502_v26  ;;  %v1941_v26 = vld [vmem:[#allocation7 + $0x1b8] sm:$0xff] }
 0x542   :  { %v3195_v9 = vpop.eup %3194 }
 0x543   :  { %v3197_v2 = vpop.eup %3196  ;;  %v1506_v14 = vmul.f32 %v3195_v9, %v3193_v18  ;;  %v1935_v18 = vld [vmem:[#allocation7 + $0x188] sm:$0xff] }
 0x544   :  { %v1505_v59 = vmul.f32 %v3197_v2, %v3762_v23  ;;  %v3199_v7 = vpop.eup %3198  ;;  %v1939_v9 = vld [vmem:[#allocation7 + $0x1a8] sm:$0xff]  ;;  %v1937_v2 = vld [vmem:[#allocation7 + $0x198] sm:$0xff] }
 0x546   :  { %v3805_v46 = vadd.f32 %v1506_v14, %v1505_v59  ;;  %v3863_v14 = vpack.c.bf16 %v1939_v9, %v1935_v18  ;;  %v1934_v59 = vld [vmem:[#allocation7 + $0x180] sm:$0xff] }
 0x548   :  { %3200 = vtanh.f32 %v3805_v46 }
 0x552   :  { %v3201_v10 = vpop.eup %3200 }
 0x553   :  { %v1509_v31 = vmul.f32 %v3201_v10, %v3199_v7  ;;  %v1938_v7 = vld [vmem:[#allocation7 + $0x1a0] sm:$0xff]  ;;  %v3866_v10 = vpack.c.bf16 %v1941_v26, %v1937_v2 }
 0x555   :  { %v1511_v32 = vcombine.high %v1509_v31, %v1509_v31  ;;  %v1518_v41 = vrot.slane %v1509_v31, %v3567_v50  ;;  %1710 = vmatmul.mubr.f32.vlgmr.msra.gmra.mrb[10].mxu0 %v1509_v31  ;;  %1781 = vmatmul.mubr.f32.vlgmr.msra.gmra.mrb[10].mxu1 %v1509_v31  ;;  %v1936_v31 = vld [vmem:[#allocation7 + $0x190] sm:$0xff] }
 0x556   :  { %3018 = vmatpush1.bf16.msra.mxu1 %v3724_v8  ;;  %2014 = vmatprep.mubr.f32.mxu0 %v3372_v0 }
 0x557   :  { %v1525_v22 = vrot.slane %v1511_v32, %v3567_v50  ;;  %v1526_v12 = vcombine.high %v1518_v41, %v1518_v41  ;;  %v1534_v19 = vrot.slane %v1518_v41, %v3567_v50  ;;  %2574 = vst.sshfl [vmem:[#allocation9 + $0x4] sm:$0x1 pattern:$0x73625140] %v1518_v41  ;;  %3020 = vmatprep.subr.bf16.mxu1 %v3728_v5  ;;  %v1940_v32 = vld [vmem:[#allocation7 + $0x1b0] sm:$0xff]  ;;  %v1943_v41 = vld [vmem:[#allocation7 + $0x1c8] sm:$0xff] }
 0x558   :  { %2085 = vmatprep.mubr.f32.mxu1 %v3372_v0 }
 0x559   :  { %v1527_v23 = vcombine.high %v1525_v22, %v1525_v22  ;;  %v1541_v29 = vrot.slane %v1525_v22, %v3567_v50  ;;  %v1548_v36 = vrot.slane %v1526_v12, %v3567_v50  ;;  %v1556_v21 = vcombine.high %v1534_v19, %v1534_v19  ;;  %2575 = vst.sshfl [vmem:[#allocation9 + $0xc] sm:$0x1 pattern:$0x73625140] %v1526_v12  ;;  %v1947_v19 = vld [vmem:[#allocation7 + $0x1e8] sm:$0xff] }
 0x55a   :  { %2576 = vst.sshfl [vmem:[#allocation9 + $0x24] sm:$0x1 pattern:$0x73625140] %v1525_v22  ;;  %3022 = vmatpush1.bf16.msra.mxu1 %v3730_v30  ;;  %v1887_v30 = vld [vmem:[#allocation7 + $0x8] sm:$0xff]  ;;  %v3869_v22 = vpack.c.bf16 %v1938_v7, %v1934_v59  ;;  %v3871_v12 = vpack.c.bf16 %v1940_v32, %v1936_v31 }
 0x55b   :  { %v1555_v8 = vrot.slane %v1527_v23, %v3567_v50  ;;  %v1557_v44 = vcombine.high %v1541_v29, %v1541_v29  ;;  %v1558_v49 = vcombine.high %v1548_v36, %v1548_v36  ;;  %1570 = vst [vmem:[#allocation9 + $0x14] sm:$0x1] %v1556_v21  ;;  %2577 = vst.sshfl [vmem:[#allocation9 + $0x2c] sm:$0x1 pattern:$0x73625140] %v1527_v23  ;;  %3024 = vmatprep.subr.bf16.mxu1 %v3734_v55 }
 0x55c   :  { %v3826_v13 = vpack.c.bf16 %v1891_v25, %v1887_v30  ;;  %v1886_v55 = vld [vmem:[#allocation7] sm:$0xff]  ;;  %v1945_v23 = vld [vmem:[#allocation7 + $0x1d8] sm:$0xff]  ;;  %v3875_v36 = vpack.c.bf16 %v1947_v19, %v1943_v41 }
 0x55d   :  { %v1559_v5 = vcombine.high %v1555_v8, %v1555_v8  ;;  %1571 = vst [vmem:[#allocation9 + $0x1c] sm:$0x1] %v1558_v49  ;;  %1574 = vst [vmem:[#allocation9 + $0x34] sm:$0x1] %v1557_v44  ;;  %v3828_v56 = vpack.c.bf16 %v1890_v54, %v1886_v55  ;;  %v1949_v29 = vld [vmem:[#allocation7 + $0x1f8] sm:$0xff]  ;;  %v1942_v8 = vld [vmem:[#allocation7 + $0x1c0] sm:$0xff] }
 0x55e   :  { %3026 = vmatpush1.bf16.msra.mxu1 %v3736_v27  ;;  %2984 = vmatprep.subr.bf16.mxu0 %v3826_v13  ;;  %v1895_v27 = vld [vmem:[#allocation7 + $0x48] sm:$0xff]  ;;  %v3877_v21 = vpack.c.bf16 %v1949_v29, %v1945_v23  ;;  %v1946_v44 = vld [vmem:[#allocation7 + $0x1e0] sm:$0xff]  ;;  %v1944_v49 = vld [vmem:[#allocation7 + $0x1d0] sm:$0xff] }
 0x55f   :  { %1575 = vst [vmem:[#allocation9 + $0x3c] sm:$0x1] %v1559_v5  ;;  %3028 = vmatprep.subr.bf16.mxu1 %v3740_v40  ;;  %2986 = vmatpush1.bf16.msra.mxu0 %v3828_v56  ;;  %v1899_v40 = vld [vmem:[#allocation7 + $0x68] sm:$0xff]  ;;  %v1948_v5 = vld [vmem:[#allocation7 + $0x1f0] sm:$0xff]  ;;  %v3884_v25 = vpack.c.bf16 %v1946_v44, %v1942_v8  ;;  %v1577_v55 = vld [vmem:[#allocation4 + $0xa0] sm:$0xff] }
 0x560   :  { %v3880_v30 = vpack.c.bf16 %v1948_v5, %v1944_v49  ;;  %v1578_v54 = vld [vmem:[#allocation4 + $0xa8] sm:$0xff]  ;;  %v2205_v5 = vld [vmem:[#allocation7 + $0x70] sm:$0xff] }
 0x562   :  { %3030 = vmatpush1.bf16.msra.mxu1 %v3742_v11  ;;  %v3832_v11 = vpack.c.bf16 %v1899_v40, %v1895_v27 }
 0x563   :  { %3032 = vmatprep.subr.bf16.mxu1 %v3746_v20  ;;  %v1894_v20 = vld [vmem:[#allocation7 + $0x40] sm:$0xff] }
 0x564   :  { %2988 = vmatprep.subr.bf16.mxu0 %v3832_v11 }
 0x566   :  { %3034 = vmatpush1.bf16.msra.mxu1 %v3748_v35  ;;  %v1898_v35 = vld [vmem:[#allocation7 + $0x60] sm:$0xff] }
 0x567   :  { %3036 = vmatprep.subr.bf16.mxu1 %v3752_v43  ;;  %v3834_v33 = vpack.c.bf16 %v1898_v35, %v1894_v20  ;;  %v1903_v43 = vld [vmem:[#allocation7 + $0x88] sm:$0xff] }
 0x568   :  { %v3838_v45 = vpack.c.bf16 %v1907_v61, %v1903_v43 }
 0x569   :  { %2990 = vmatpush1.bf16.msra.mxu0 %v3834_v33 }
 0x56a   :  { %2992 = vmatprep.subr.bf16.mxu0 %v3838_v45  ;;  %3038 = vmatpush1.bf16.msra.mxu1 %v3860_v15 }
 0x56b   :  { %3040 = vmatprep.subr.bf16.mxu1 %v3866_v10 }
 0x56d   :  { %2994 = vmatpush1.bf16.msra.mxu0 %v3840_v48 }
 0x56e   :  { %2996 = vmatprep.subr.bf16.mxu0 %v3844_v4  ;;  %3042 = vmatpush1.bf16.msra.mxu1 %v3871_v12 }
 0x56f   :  { %3044 = vmatprep.subr.bf16.mxu1 %v3877_v21 }
 0x571   :  { %2998 = vmatpush1.bf16.msra.mxu0 %v3846_v42 }
 0x572   :  { %3000 = vmatprep.subr.bf16.mxu0 %v3850_v39  ;;  %3046 = vmatpush1.bf16.msra.mxu1 %v3880_v30 }
 0x575   :  { %3002 = vmatpush1.bf16.msra.mxu0 %v3852_v16 }
 0x576   :  { %3004 = vmatprep.subr.bf16.mxu0 %v3856_v51 }
 0x579   :  { %3006 = vmatpush1.bf16.msra.mxu0 %v3858_v1 }
 0x57a   :  { %3008 = vmatprep.subr.bf16.mxu0 %v3863_v14 }
 0x57d   :  { %3010 = vmatpush1.bf16.msra.mxu0 %v3869_v22 }
 0x57e   :  { %3012 = vmatprep.subr.bf16.mxu0 %v3875_v36 }
 0x581   :  { %3014 = vmatpush1.bf16.msra.mxu0 %v3884_v25 }
 0x582   :  { %3048 = vmatprep.subr.bf16.mxu0 %v3826_v13 }
 0x628   :  { %v1711_v27 = vpop.f32.mrb[10].mxu0  ;;  %v1782_v40 = vpop.f32.mrb[10].mxu1 }
 0x629   :  { %v1787_v20 = vadd.f32 %v1711_v27, %v1577_v55  ;;  %v1713_v35 = vpop.f32.mrb[11].mxu0  ;;  %v1784_v43 = vpop.f32.mrb[11].mxu1  ;;  %v1789_v58 = vadd.f32 %v1782_v40, %v1579_v3  ;;  %v2218_v40 = vld [vmem:[#allocation7 + $0xd8] sm:$0xff]  ;;  %v2225_v3 = vld [vmem:[#allocation7 + $0x110] sm:$0xff] }
 0x62a   :  { %v1788_v61 = vadd.f32 %v1713_v35, %v1578_v54  ;;  %v1790_v63 = vadd.f32 %v1784_v43, %v1580_v52  ;;  %v2213_v54 = vld [vmem:[#allocation7 + $0xb0] sm:$0xff]  ;;  %v2230_v52 = vld [vmem:[#allocation7 + $0x138] sm:$0xff] }
 0x62b   :  { %v2578_v62 = vmul.f32 -1.442695, %v1787_v20  ;;  %v2222_v20 = vld [vmem:[#allocation7 + $0xf8] sm:$0xff]  ;;  %v2217_v43 = vld [vmem:[#allocation7 + $0xd0] sm:$0xff] }
 0x62c   :  { %v2579_v60 = vmul.f32 -1.442695, %v1788_v61  ;;  %v2580_v17 = vmul.f32 -1.442695, %v1790_v63  ;;  %v3091_v35 = vpack.c.bf16 %v2222_v20, %v2218_v40  ;;  %v2221_v61 = vld [vmem:[#allocation7 + $0xf0] sm:$0xff] }
 0x62d   :  { %3202 = vpow2.f32 %v2578_v62  ;;  %v3093_v62 = vpack.c.bf16 %v2221_v61, %v2217_v43 }
 0x62e   :  { %3204 = vpow2.f32 %v2579_v60  ;;  %v2226_v60 = vld [vmem:[#allocation7 + $0x118] sm:$0xff] }
 0x62f   :  { %3206 = vpow2.f32 %v2580_v17  ;;  %v3095_v63 = vpack.c.bf16 %v2230_v52, %v2226_v60  ;;  %v2229_v17 = vld [vmem:[#allocation7 + $0x130] sm:$0xff] }
 0x630   :  { %3208 = vtanh.f32 %v1789_v58  ;;  %v3097_v58 = vpack.c.bf16 %v2229_v17, %v2225_v3  ;;  %v2189_v52 = vld [vmem:[#allocation4 + $0xf0] sm:$0xff] }
 0x637   :  { %v3203_v24 = vpop.eup %3202 }
 0x638   :  { %v3205_v47 = vpop.eup %3204  ;;  %v1794_v13 = vadd.f32 1.0, %v3203_v24  ;;  %v2234_v24 = vld [vmem:[#allocation7 + $0x158] sm:$0xff] }
 0x639   :  { %v1800_v6 = vadd.f32 1.0, %v3205_v47  ;;  %v3207_v28 = vpop.eup %3206  ;;  %v2238_v47 = vld [vmem:[#allocation7 + $0x178] sm:$0xff] }
 0x63a   :  { %3210 = vrcp.f32 %v1794_v13  ;;  %v3209_v38 = vpop.eup %3208  ;;  %v1807_v57 = vadd.f32 1.0, %v3207_v28  ;;  %v3099_v13 = vpack.c.bf16 %v2238_v47, %v2234_v24  ;;  %v1883_v28 = vld [vmem:[#allocation4 + $0xc8] sm:$0xff] }
 0x63b   :  { %3212 = vrcp.f32 %v1800_v6  ;;  %v1882_v6 = vld [vmem:[#allocation4 + $0xc0] sm:$0xff] }
 0x63c   :  { %3214 = vrcp.f32 %v1807_v57 }
 0x644   :  { %v3211_v34 = vpop.eup %3210 }
 0x645   :  { %v3213_v53 = vpop.eup %3212  ;;  %v1811_v37 = vmul.f32 %v3211_v34, %v3209_v38 }
 0x646   :  { %v1810_v18 = vmul.f32 %v3213_v53, %v3805_v46  ;;  %v3215_v2 = vpop.eup %3214 }
 0x648   :  { %v3891_v9 = vadd.f32 %v1811_v37, %v1810_v18 }
 0x64a   :  { %3216 = vtanh.f32 %v3891_v9 }
 0x654   :  { %v3217_v26 = vpop.eup %3216 }
 0x655   :  { %v1814_v59 = vmul.f32 %v3217_v26, %v3215_v2 }
 0x657   :  { %v1816_v7 = vcombine.high %v1814_v59, %v1814_v59  ;;  %v1823_v31 = vrot.slane %v1814_v59, %v3567_v50  ;;  %2015 = vmatmul.mubr.f32.vlgmr.msra.gmra.mrb[12].mxu0 %v1814_v59  ;;  %2086 = vmatmul.mubr.f32.vlgmr.msra.gmra.mrb[12].mxu1 %v1814_v59  ;;  %v1884_v59 = vld [vmem:[#allocation4 + $0xd0] sm:$0xff] }
 0x658   :  { %3050 = vmatpush1.bf16.msra.mxu0 %v3828_v56  ;;  %2319 = vmatprep.mubr.f32.mxu0 %v3372_v0 }
 0x659   :  { %v1830_v32 = vrot.slane %v1816_v7, %v3567_v50  ;;  %v1831_v46 = vcombine.high %v1823_v31, %v1823_v31  ;;  %v1839_v41 = vrot.slane %v1823_v31, %v3567_v50  ;;  %2581 = vst.sshfl [vmem:[#allocation9 + $0x5] sm:$0x1 pattern:$0x73625140] %v1823_v31  ;;  %3052 = vmatprep.subr.bf16.mxu0 %v3832_v11 }
 0x65a   :  { %2390 = vmatprep.mubr.f32.mxu1 %v3372_v0  ;;  %v2194_v0 = vld [vmem:[#allocation7 + $0x18] sm:$0xff] }
 0x65b   :  { %v1832_v19 = vcombine.high %v1830_v32, %v1830_v32  ;;  %v1846_v23 = vrot.slane %v1830_v32, %v3567_v50  ;;  %v1853_v29 = vrot.slane %v1831_v46, %v3567_v50  ;;  %v1861_v8 = vcombine.high %v1839_v41, %v1839_v41  ;;  %2582 = vst.sshfl [vmem:[#allocation9 + $0xd] sm:$0x1 pattern:$0x73625140] %v1831_v46 }
 0x65c   :  { %2583 = vst.sshfl [vmem:[#allocation9 + $0x25] sm:$0x1 pattern:$0x73625140] %v1830_v32  ;;  %3054 = vmatpush1.bf16.msra.mxu0 %v3834_v33  ;;  %v2198_v33 = vld [vmem:[#allocation7 + $0x38] sm:$0xff] }
 0x65d   :  { %v1860_v56 = vrot.slane %v1832_v19, %v3567_v50  ;;  %v1862_v44 = vcombine.high %v1846_v23, %v1846_v23  ;;  %v1863_v49 = vcombine.high %v1853_v29, %v1853_v29  ;;  %1875 = vst [vmem:[#allocation9 + $0x15] sm:$0x1] %v1861_v8  ;;  %2584 = vst.sshfl [vmem:[#allocation9 + $0x2d] sm:$0x1 pattern:$0x73625140] %v1832_v19  ;;  %3056 = vmatprep.subr.bf16.mxu0 %v3838_v45 }
 0x65e   :  { %v3079_v45 = vpack.c.bf16 %v2198_v33, %v2194_v0 }
 0x65f   :  { %v1864_v11 = vcombine.high %v1860_v56, %v1860_v56  ;;  %1876 = vst [vmem:[#allocation9 + $0x1d] sm:$0x1] %v1863_v49  ;;  %1879 = vst [vmem:[#allocation9 + $0x35] sm:$0x1] %v1862_v44 }
 0x660   :  { %3058 = vmatpush1.bf16.msra.mxu0 %v3840_v48  ;;  %v2193_v48 = vld [vmem:[#allocation7 + $0x10] sm:$0xff]  ;;  %3080 = vmatprep.subr.bf16.mxu1 %v3079_v45 }
 0x661   :  { %1880 = vst [vmem:[#allocation9 + $0x3d] sm:$0x1] %v1864_v11  ;;  %3060 = vmatprep.subr.bf16.mxu0 %v3844_v4  ;;  %v2197_v4 = vld [vmem:[#allocation7 + $0x30] sm:$0xff] }
 0x664   :  { %3062 = vmatpush1.bf16.msra.mxu0 %v3846_v42  ;;  %v3081_v42 = vpack.c.bf16 %v2197_v4, %v2193_v48 }
 0x665   :  { %3064 = vmatprep.subr.bf16.mxu0 %v3850_v39  ;;  %v2202_v39 = vld [vmem:[#allocation7 + $0x58] sm:$0xff] }
 0x666   :  { %3082 = vmatpush1.bf16.msra.mxu1 %v3081_v42 }
 0x668   :  { %3066 = vmatpush1.bf16.msra.mxu0 %v3852_v16  ;;  %v2206_v16 = vld [vmem:[#allocation7 + $0x78] sm:$0xff] }
 0x669   :  { %3068 = vmatprep.subr.bf16.mxu0 %v3856_v51  ;;  %v3083_v51 = vpack.c.bf16 %v2206_v16, %v2202_v39 }
 0x66b   :  { %3084 = vmatprep.subr.bf16.mxu1 %v3083_v51 }
 0x66c   :  { %3070 = vmatpush1.bf16.msra.mxu0 %v3858_v1  ;;  %v2201_v1 = vld [vmem:[#allocation7 + $0x50] sm:$0xff] }
 0x66d   :  { %3072 = vmatprep.subr.bf16.mxu0 %v3863_v14  ;;  %v3085_v14 = vpack.c.bf16 %v2205_v5, %v2201_v1 }
 0x66f   :  { %3086 = vmatpush1.bf16.msra.mxu1 %v3085_v14 }
 0x670   :  { %3074 = vmatpush1.bf16.msra.mxu0 %v3869_v22  ;;  %v2210_v22 = vld [vmem:[#allocation7 + $0x98] sm:$0xff] }
 0x671   :  { %3076 = vmatprep.subr.bf16.mxu0 %v3875_v36  ;;  %v2214_v36 = vld [vmem:[#allocation7 + $0xb8] sm:$0xff] }
 0x672   :  { %v3087_v55 = vpack.c.bf16 %v2214_v36, %v2210_v22  ;;  %v2187_v36 = vld [vmem:[#allocation4 + $0xe0] sm:$0xff] }
 0x674   :  { %3078 = vmatpush1.bf16.msra.mxu0 %v3884_v25  ;;  %v2209_v25 = vld [vmem:[#allocation7 + $0x90] sm:$0xff]  ;;  %3088 = vmatprep.subr.bf16.mxu1 %v3087_v55  ;;  %v2188_v55 = vld [vmem:[#allocation4 + $0xe8] sm:$0xff] }
 0x675   :  { %v3089_v27 = vpack.c.bf16 %v2213_v54, %v2209_v25 }
 0x677   :  { %3090 = vmatpush1.bf16.msra.mxu1 %v3089_v27 }
 0x678   :  { %3092 = vmatprep.subr.bf16.mxu1 %v3091_v35 }
 0x67b   :  { %3094 = vmatpush1.bf16.msra.mxu1 %v3093_v62  ;;  %v2190_v62 = vld [vmem:[#allocation4 + $0xf8] sm:$0xff] }
 0x67c   :  { %3096 = vmatprep.subr.bf16.mxu1 %v3095_v63 }
 0x67f   :  { %3098 = vmatpush1.bf16.msra.mxu1 %v3097_v58 }
 0x680   :  { %3100 = vmatprep.subr.bf16.mxu1 %v3099_v13 }
 0x683   :  { %3102 = vmatpush1.bf16.msra.mxu1 %v3860_v15  ;;  %v1885_v15 = vld [vmem:[#allocation4 + $0xd8] sm:$0xff] }
 0x684   :  { %3104 = vmatprep.subr.bf16.mxu1 %v3866_v10 }
 0x687   :  { %3106 = vmatpush1.bf16.msra.mxu1 %v3871_v12 }
 0x688   :  { %3108 = vmatprep.subr.bf16.mxu1 %v3877_v21 }
 0x68b   :  { %3110 = vmatpush1.bf16.msra.mxu1 %v3880_v30 }
 0x72a   :  { %v2016_v38 = vpop.f32.mrb[12].mxu0  ;;  %v2087_v34 = vpop.f32.mrb[12].mxu1 }
 0x72b   :  { %v2092_v53 = vadd.f32 %v2016_v38, %v1882_v6  ;;  %v2018_v37 = vpop.f32.mrb[13].mxu0  ;;  %v2089_v57 = vpop.f32.mrb[13].mxu1  ;;  %v2094_v7 = vadd.f32 %v2087_v34, %v1884_v59 }
 0x72c   :  { %v2093_v18 = vadd.f32 %v2018_v37, %v1883_v28  ;;  %v2095_v10 = vadd.f32 %v2089_v57, %v1885_v15 }
 0x72d   :  { %v2585_v2 = vmul.f32 -1.442695, %v2092_v53 }
 0x72e   :  { %v2586_v26 = vmul.f32 -1.442695, %v2093_v18  ;;  %v2587_v12 = vmul.f32 -1.442695, %v2095_v10 }
 0x72f   :  { %3218 = vpow2.f32 %v2585_v2 }
 0x730   :  { %3220 = vpow2.f32 %v2586_v26 }
 0x731   :  { %3222 = vpow2.f32 %v2587_v12 }
 0x732   :  { %3224 = vtanh.f32 %v2094_v7 }
 0x739   :  { %v3219_v21 = vpop.eup %3218 }
 0x73a   :  { %v3221_v31 = vpop.eup %3220  ;;  %v2099_v30 = vadd.f32 1.0, %v3219_v21 }
 0x73b   :  { %v2105_v32 = vadd.f32 1.0, %v3221_v31  ;;  %v3223_v46 = vpop.eup %3222 }
 0x73c   :  { %3226 = vrcp.f32 %v2099_v30  ;;  %v3225_v41 = vpop.eup %3224  ;;  %v2112_v8 = vadd.f32 1.0, %v3223_v46 }
 0x73d   :  { %3228 = vrcp.f32 %v2105_v32 }
 0x73e   :  { %3230 = vrcp.f32 %v2112_v8 }
 0x746   :  { %v3227_v19 = vpop.eup %3226 }
 0x747   :  { %v3229_v23 = vpop.eup %3228  ;;  %v2116_v29 = vmul.f32 %v3227_v19, %v3225_v41 }
 0x748   :  { %v2115_v56 = vmul.f32 %v3229_v23, %v3891_v9  ;;  %v3231_v49 = vpop.eup %3230 }
 0x74a   :  { %v2117_v44 = vadd.f32 %v2116_v29, %v2115_v56 }
 0x74c   :  { %3232 = vtanh.f32 %v2117_v44 }
 0x756   :  { %v3233_v11 = vpop.eup %3232 }
 0x757   :  { %v2119_v0 = vmul.f32 %v3233_v11, %v3231_v49 }
 0x759   :  { %v2121_v33 = vcombine.high %v2119_v0, %v2119_v0  ;;  %v2128_v45 = vrot.slane %v2119_v0, %v3567_v50  ;;  %2320 = vmatmul.mubr.f32.vlgmr.msra.gmra.mrb[14].mxu0 %v2119_v0  ;;  %2391 = vmatmul.mubr.f32.vlgmr.msra.gmra.mrb[14].mxu1 %v2119_v0 }
 0x75b   :  { %v2135_v48 = vrot.slane %v2121_v33, %v3567_v50  ;;  %v2136_v4 = vcombine.high %v2128_v45, %v2128_v45  ;;  %v2144_v42 = vrot.slane %v2128_v45, %v3567_v50  ;;  %2588 = vst.sshfl [vmem:[#allocation9 + $0x6] sm:$0x1 pattern:$0x73625140] %v2128_v45 }
 0x75d   :  { %v2137_v39 = vcombine.high %v2135_v48, %v2135_v48  ;;  %v2151_v9 = vrot.slane %v2135_v48, %v3567_v50  ;;  %v2158_v16 = vrot.slane %v2136_v4, %v3567_v50  ;;  %v2166_v51 = vcombine.high %v2144_v42, %v2144_v42  ;;  %2589 = vst.sshfl [vmem:[#allocation9 + $0xe] sm:$0x1 pattern:$0x73625140] %v2136_v4 }
 0x75e   :  { %2590 = vst.sshfl [vmem:[#allocation9 + $0x26] sm:$0x1 pattern:$0x73625140] %v2135_v48 }
 0x75f   :  { %v2165_v1 = vrot.slane %v2137_v39, %v3567_v50  ;;  %v2167_v5 = vcombine.high %v2151_v9, %v2151_v9  ;;  %v2168_v14 = vcombine.high %v2158_v16, %v2158_v16  ;;  %2180 = vst [vmem:[#allocation9 + $0x16] sm:$0x1] %v2166_v51  ;;  %2591 = vst.sshfl [vmem:[#allocation9 + $0x2e] sm:$0x1 pattern:$0x73625140] %v2137_v39 }
 0x761   :  { %v2169_v22 = vcombine.high %v2165_v1, %v2165_v1  ;;  %2181 = vst [vmem:[#allocation9 + $0x1e] sm:$0x1] %v2168_v14  ;;  %2184 = vst [vmem:[#allocation9 + $0x36] sm:$0x1] %v2167_v5 }
 0x763   :  { %2185 = vst [vmem:[#allocation9 + $0x3e] sm:$0x1] %v2169_v22 }
 0x82c   :  { %v2321_v25 = vpop.f32.mrb[14].mxu0  ;;  %v2392_v54 = vpop.f32.mrb[14].mxu1 }
 0x82d   :  { %v2397_v27 = vadd.f32 %v2321_v25, %v2187_v36  ;;  %v2323_v40 = vpop.f32.mrb[15].mxu0  ;;  %v2394_v20 = vpop.f32.mrb[15].mxu1  ;;  %v2399_v3 = vadd.f32 %v2392_v54, %v2189_v52 }
 0x82e   :  { %v2398_v35 = vadd.f32 %v2323_v40, %v2188_v55  ;;  %v2400_v60 = vadd.f32 %v2394_v20, %v2190_v62 }
 0x82f   :  { %v2592_v43 = vmul.f32 -1.442695, %v2397_v27 }
 0x830   :  { %v2593_v61 = vmul.f32 -1.442695, %v2398_v35  ;;  %v2594_v63 = vmul.f32 -1.442695, %v2400_v60 }
 0x831   :  { %3234 = vpow2.f32 %v2592_v43 }
 0x832   :  { %3236 = vpow2.f32 %v2593_v61 }
 0x833   :  { %3238 = vpow2.f32 %v2594_v63 }
 0x834   :  { %3240 = vtanh.f32 %v2399_v3 }
 0x83b   :  { %v3235_v17 = vpop.eup %3234 }
 0x83c   :  { %v3237_v58 = vpop.eup %3236  ;;  %v2404_v24 = vadd.f32 1.0, %v3235_v17 }
 0x83d   :  { %v2410_v47 = vadd.f32 1.0, %v3237_v58  ;;  %v3239_v13 = vpop.eup %3238 }
 0x83e   :  { %3242 = vrcp.f32 %v2404_v24  ;;  %v3241_v6 = vpop.eup %3240  ;;  %v2417_v53 = vadd.f32 1.0, %v3239_v13 }
 0x83f   :  { %3244 = vrcp.f32 %v2410_v47 }
 0x840   :  { %3246 = vrcp.f32 %v2417_v53 }
 0x848   :  { %v3243_v28 = vpop.eup %3242 }
 0x849   :  { %v3245_v38 = vpop.eup %3244  ;;  %v2421_v34 = vmul.f32 %v3243_v28, %v3241_v6 }
 0x84a   :  { %v2420_v37 = vmul.f32 %v3245_v38, %v2117_v44  ;;  %v3247_v18 = vpop.eup %3246 }
 0x84c   :  { %v2422_v57 = vadd.f32 %v2421_v34, %v2420_v37 }
 0x84e   :  { %2497 = vst [vmem:[#allocation12] sm:$0xff] %v2422_v57  ;;  %3248 = vtanh.f32 %v2422_v57 }
 0x858   :  { %v3249_v2 = vpop.eup %3248 }
 0x859   :  { %v2424_v26 = vmul.f32 %v3249_v2, %v3247_v18 }
 0x85b   :  { %v2426_v15 = vcombine.high %v2424_v26, %v2424_v26  ;;  %v2433_v10 = vrot.slane %v2424_v26, %v3567_v50  ;;  %2496 = vst [vmem:[#allocation10] sm:$0xff] %v2424_v26 }
 0x85c   :  { %3305 = shalt.err (!%p3302_p6)
}
 0x85d   :  { %s3306_s20 = scalar_lea.hbm %s3981_s3, 128 }
 0x85e   :  { %p3307_p7 = scmp.ne.s32.totalorder %s3981_s3, %s3306_s20  ;;  %p3310_p8 = scmp.lt.u32.totalorder %s3306_s20, %s3981_s3 }
 0x860   :  { %p3312_p9 = pnand %p3310_p8, %p3307_p7 }
 0x862   :  { %3315 = shalt.err (!%p3312_p9)
}
 0x863   :  { %2519 = dma.vmem_to_hbm [thread:$0]  %s2517_s14, 128, %s3981_s3, [#allocation11]   ;;  %v2440_v59 = vrot.slane %v2426_v15, %v3567_v50  ;;  %v2441_v12 = vcombine.high %v2433_v10, %v2433_v10  ;;  %v2449_v7 = vrot.slane %v2433_v10, %v3567_v50  ;;  %2595 = vst.sshfl [vmem:[#allocation9 + $0x7] sm:$0x1 pattern:$0x73625140] %v2433_v10 }
 0x864   :  { %s3316_s27 = scalar_lea.vmem %s3929_s16, 128  ;;  %p3321_p11 = scmp.lt.s32.totalorder %s3929_s16, %s3929_s16 }
 0x865   :  { %p3317_p10 = scmp.ne.s32.totalorder %s3929_s16, %s3316_s27  ;;  %p3322_p12 = scmp.lt.s32.totalorder %s3316_s27, %s3316_s27 }
 0x867   :  { %p3323_p13 = por %p3322_p12, %p3321_p11 }
 0x869   :  { %p3324_p0 = pnand %p3323_p13, %p3317_p10 }
 0x86b   :  { %3327 = shalt.err (!%p3324_p0)
}
 0x86c   :  { %s3328_s30 = scalar_lea.hbm %s3982_s4, 128 }
 0x86d   :  { %p3329_p1 = scmp.ne.s32.totalorder %s3982_s4, %s3328_s30  ;;  %p3332_p2 = scmp.lt.u32.totalorder %s3328_s30, %s3982_s4 }
 0x86f   :  { %p3334_p3 = pnand %p3332_p2, %p3329_p1 }
 0x871   :  { %3337 = shalt.err (!%p3334_p3)
}
 0x872   :  { %2529 = dma.vmem_to_hbm [thread:$0]  %s3929_s16, 128, %s3982_s4, [#allocation11]   ;;  %v2442_v21 = vcombine.high %v2440_v59, %v2440_v59  ;;  %v2456_v31 = vrot.slane %v2440_v59, %v3567_v50  ;;  %v2463_v30 = vrot.slane %v2441_v12, %v3567_v50  ;;  %v2471_v32 = vcombine.high %v2449_v7, %v2449_v7  ;;  %2596 = vst.sshfl [vmem:[#allocation9 + $0xf] sm:$0x1 pattern:$0x73625140] %v2441_v12 }
 0x873   :  { %2597 = vst.sshfl [vmem:[#allocation9 + $0x27] sm:$0x1 pattern:$0x73625140] %v2440_v59  ;;  %s3376_s10 = smov [#allocation9]  }
 0x874   :  { %s2503_s11 = sshll.u32 %s3376_s10, 4  ;;  %v2470_v46 = vrot.slane %v2442_v21, %v3567_v50  ;;  %v2472_v41 = vcombine.high %v2456_v31, %v2456_v31  ;;  %v2473_v19 = vcombine.high %v2463_v30, %v2463_v30  ;;  %2485 = vst [vmem:[#allocation9 + $0x17] sm:$0x1] %v2471_v32  ;;  %s2504_s11 = int_to_ptr.vmem [resolvable:$true] %s2503_s11 }
 0x875   :  { %2598 = vst.sshfl [vmem:[#allocation9 + $0x2f] sm:$0x1 pattern:$0x73625140] %v2442_v21  ;;  %s3338_s4 = scalar_lea.vmem %s2504_s11, 1024  ;;  %p3343_p5 = scmp.lt.s32.totalorder %s2504_s11, %s2504_s11 }
 0x876   :  { %v2474_v23 = vcombine.high %v2470_v46, %v2470_v46  ;;  %2486 = vst [vmem:[#allocation9 + $0x1f] sm:$0x1] %v2473_v19  ;;  %2489 = vst [vmem:[#allocation9 + $0x37] sm:$0x1] %v2472_v41  ;;  %p3339_p4 = scmp.ne.s32.totalorder %s2504_s11, %s3338_s4  ;;  %p3344_p6 = scmp.lt.s32.totalorder %s3338_s4, %s3338_s4 }
 0x878   :  { %2490 = vst [vmem:[#allocation9 + $0x3f] sm:$0x1] %v2474_v23  ;;  %p3345_p7 = por %p3344_p6, %p3343_p5 }
 0x87a   :  { %p3346_p8 = pnand %p3345_p7, %p3339_p4 }
 0x87c   :  { %3349 = shalt.err (!%p3346_p8)
}
 0x87d   :  { %s3350_s13 = scalar_lea.hbm %s3980_s2, 1024 }
 0x87e   :  { %p3351_p9 = scmp.ne.s32.totalorder %s3980_s2, %s3350_s13  ;;  %p3354_p10 = scmp.lt.u32.totalorder %s3350_s13, %s3980_s2 }
 0x880   :  { %p3356_p11 = pnand %p3354_p10, %p3351_p9 }
 0x882   :  { %3359 = shalt.err (!%p3356_p11)
}
 0x883   :  { %s3377_s17 = smov 128   ;;  %s3378_s18 = smov 8  }
 0x884   :  { %2509 = dma.vmem_to_hbm [thread:$0]  %s2504_s11, 1024, %s3980_s2, [#allocation6], %s3377_s17, %s3377_s17, %s3378_s18  }
 0x885   :  { %3364 = dma.done.wait [#allocation6], 1024  }
 0x886   :  { %3365 = vsyncadd [#allocation6], 4294966272 }
 0x887   :  { %3366 = dma.done.wait [#allocation11], 256  }
 0x888   :  { %3367 = vsyncadd [#allocation11], 4294967040 }
 0x889   :  { %2539 = vsyncpa [#allocation5], 1 }
 0x88a   :  { %2540 = vsyncpa [#allocation8], 1 }
 0x88b   :  { %2541 = vsyncpa [#allocation6], 1 }
 0x88c   :  { %2542 = vsyncpa [#allocation11], 1 }

</bundles_post_ra>
